<compile_context>
chip_gen: v7x
topology: tpu7x:2x2x1
jax: 0.10.0
libtpu: 0.0.40
codegen_flags: <defaults>
</compile_context>

<pallas_src>
import functools

import jax
import jax.numpy as jnp
from jax.experimental import pallas as pl
from jax.experimental.pallas import tpu as pltpu

EPS = 1e-5  # BatchNorm2d default eps


def _round_up(x, m):
    return ((x + m - 1) // m) * m


def _vmem_limit_bytes():
    # Generation-aware: leave ~16 MiB headroom for double buffers / internal scratch.
    try:
        cap = int(pltpu.get_tpu_info().vmem_capacity_bytes)
    except Exception:
        return 32 * 1024 * 1024
    return max(cap - 16 * 1024 * 1024, 16 * 1024 * 1024)


_VMEM_LIMIT = _vmem_limit_bytes()


# ---------------------------------------------------------------------------
# Pallas kernels
# ---------------------------------------------------------------------------

def _conv_stats_kernel(x_ref, w_ref, y_ref, sum_ref, sq_ref, acc_ref):
    """Grid (m, j, k), k innermost reduction.

    x:(tm,tk) bf16   w:(tk,ct) bf16   y:(tm,ct) f32
    sum,sq:(1,1,ct) f32 per-M-tile partial BatchNorm statistics
    acc:(tm,ct) f32 VMEM scratch accumulator.
    """
    k = pl.program_id(2)

    @pl.when(k == 0)
    def _():
        acc_ref[...] = jnp.zeros_like(acc_ref)

    acc_ref[...] += jnp.dot(x_ref[...], w_ref[...],
                            preferred_element_type=jnp.float32)

    @pl.when(k == pl.num_programs(2) - 1)
    def _():
        y = acc_ref[...]
        y_ref[...] = y
        # Single-pass partial stats (sum and sum-of-squares) for this M tile.
        sum_ref[...] = jnp.sum(y, axis=0, keepdims=True).reshape(1, 1, -1)
        sq_ref[...] = jnp.sum(y * y, axis=0, keepdims=True).reshape(1, 1, -1)


def _bn_relu_kernel(y_ref, scale_ref, shift_ref, o_ref):
    """Elementwise normalize + ReLU.  y:(tm,ct)  scale,shift:(1,ct)  o:(tm,ct)."""
    o_ref[...] = jnp.maximum(y_ref[...] * scale_ref[...] + shift_ref[...], 0.0)


# ---------------------------------------------------------------------------
# Pallas wrappers
# ---------------------------------------------------------------------------

def _conv_matmul_with_stats(x2d, w2d, *, tm, tk, ct):
    Mp, Kp = x2d.shape
    Cp = w2d.shape[1]
    n_mt, n_ct, n_kt = Mp // tm, Cp // ct, Kp // tk
    return pl.pallas_call(
        _conv_stats_kernel,
        out_shape=(
            jax.ShapeDtypeStruct((Mp, Cp), jnp.float32),
            jax.ShapeDtypeStruct((n_mt, 1, Cp), jnp.float32),
            jax.ShapeDtypeStruct((n_mt, 1, Cp), jnp.float32),
        ),
        grid=(n_mt, n_ct, n_kt),
        in_specs=[
            pl.BlockSpec((tm, tk), lambda i, j, k: (i, k)),
            pl.BlockSpec((tk, ct), lambda i, j, k: (k, j)),
        ],
        out_specs=(
            pl.BlockSpec((tm, ct), lambda i, j, k: (i, j)),
            pl.BlockSpec((1, 1, ct), lambda i, j, k: (i, 0, j)),
            pl.BlockSpec((1, 1, ct), lambda i, j, k: (i, 0, j)),
        ),
        scratch_shapes=[pltpu.VMEM((tm, ct), jnp.float32)],
        compiler_params=pltpu.CompilerParams(
            dimension_semantics=("parallel", "parallel", "arbitrary"),
            vmem_limit_bytes=_VMEM_LIMIT,
        ),
    )(x2d, w2d)


def _bn_relu(y, scale, shift, *, tm, ct):
    Mp, Cp = y.shape
    return pl.pallas_call(
        _bn_relu_kernel,
        out_shape=jax.ShapeDtypeStruct((Mp, Cp), jnp.float32),
        grid=(Mp // tm, Cp // ct),
        in_specs=[
            pl.BlockSpec((tm, ct), lambda i, j: (i, j)),
            pl.BlockSpec((1, ct), lambda i, j: (0, j)),
            pl.BlockSpec((1, ct), lambda i, j: (0, j)),
        ],
        out_specs=pl.BlockSpec((tm, ct), lambda i, j: (i, j)),
        compiler_params=pltpu.CompilerParams(
            dimension_semantics=("parallel", "parallel"),
            vmem_limit_bytes=_VMEM_LIMIT,
        ),
    )(y, scale.reshape(1, Cp), shift.reshape(1, Cp))


# ---------------------------------------------------------------------------
# Layer helpers (glue + Pallas calls)
# ---------------------------------------------------------------------------

def _im2col_3x3(x):
    """NHWC -> (N*H*W, 9*C); column order (kh, kw, c), padding=1."""
    n, h, w, c = x.shape
    xp = jnp.pad(x, ((0, 0), (1, 1), (1, 1), (0, 0)))
    cols = [xp[:, kh:kh + h, kw:kw + w, :] for kh in range(3) for kw in range(3)]
    return jnp.concatenate(cols, axis=-1).reshape(n * h * w, 9 * c)


def _pick_tiles(M, K, C):
    """Lane-dense, MXU-friendly tile sizes (256-wide output tiles when possible)."""
    Cp = _round_up(C, 128)
    ct = 256 if Cp % 256 == 0 else 128
    Kp = _round_up(K, 128)
    if Kp % 512 == 0:
        tk = 512
    elif Kp % 256 == 0:
        tk = 256
    else:
        tk = 128
    if M >= 256:
        tm = 256
        Mp = _round_up(M, tm)
    else:
        Mp = _round_up(M, 8)
        tm = Mp
    return Mp, Kp, Cp, tm, tk, ct


def conv3x3_bn_relu(x, w, gamma, beta):
    """x NHWC, w torch layout (Cout, Cin, 3, 3); bias=False conv + BN(batch stats) + ReLU."""
    n, h, wd, cin = x.shape
    cout = w.shape[0]
    M, K = n * h * wd, 9 * cin

    x2d = _im2col_3x3(x)
    w2d = jnp.transpose(w, (2, 3, 1, 0)).reshape(K, cout)

    Mp, Kp, Cp, tm, tk, ct = _pick_tiles(M, K, cout)

    # Zero padding: extra rows/cols contribute exactly 0 to the matmul and stats.
    x2d = jnp.pad(x2d, ((0, Mp - M), (0, Kp - K))).astype(jnp.bfloat16)
    w2d = jnp.pad(w2d, ((0, Kp - K), (0, Cp - cout))).astype(jnp.bfloat16)
    gamma_p = jnp.pad(gamma.astype(jnp.float32), (0, Cp - cout))
    beta_p = jnp.pad(beta.astype(jnp.float32), (0, Cp - cout))

    # Pass 1: K-tiled conv matmul + per-M-tile channel sums.
    y, s, sq = _conv_matmul_with_stats(x2d, w2d, tm=tm, tk=tk, ct=ct)

    # Glue: BatchNorm batch statistics over the true N*H*W rows (train-mode,
    # biased variance — matches the nn.Module default forward).
    total = jnp.sum(s[:, 0, :], axis=0)
    total_sq = jnp.sum(sq[:, 0, :], axis=0)
    mean = total / M
    var = jnp.maximum(total_sq / M - mean * mean, 0.0)
    scale = gamma_p * jax.lax.rsqrt(var + EPS)
    shift = beta_p - mean * scale

    # Pass 2: tiled, lane-dense normalize + ReLU.
    out = _bn_relu(y, scale, shift, tm=tm, ct=ct)
    return out[:M, :cout].reshape(n, h, wd, cout)


def double_conv_forward(x_nchw, params):
    """DoubleConv forward.  Input/output NCHW to match the PyTorch module."""
    x = jnp.transpose(x_nchw, (0, 2, 3, 1)).astype(jnp.float32)  # NCHW -> NHWC
    x = conv3x3_bn_relu(x, params["w1"], params["g1"], params["b1"])
    x = conv3x3_bn_relu(x, params["w2"], params["g2"], params["b2"])
    return jnp.transpose(x, (0, 3, 1, 2))  # NHWC -> NCHW


# ---------------------------------------------------------------------------
# Parameters (deterministic synthetic init — shapes follow the nn.Module)
# ---------------------------------------------------------------------------

def init_params(key, in_channels, out_channels, mid_channels=None):
    mid = mid_channels or out_channels
    ks = jax.random.split(key, 6)

    def conv_w(k, co, ci):
        return jax.random.normal(k, (co, ci, 3, 3), jnp.float32) / (3.0 * (ci ** 0.5))

    return {
        "w1": conv_w(ks[0], mid, in_channels),
        "g1": 1.0 + 0.1 * jax.random.normal(ks[1], (mid,), jnp.float32),
        "b1": 0.1 * jax.random.normal(ks[2], (mid,), jnp.float32),
        "w2": conv_w(ks[3], out_channels, mid),
        "g2": 1.0 + 0.1 * jax.random.normal(ks[4], (out_channels,), jnp.float32),
        "b2": 0.1 * jax.random.normal(ks[5], (out_channels,), jnp.float32),
    }


if __name__ == "__main__":
    key = jax.random.PRNGKey(0)
    k_params, k_x = jax.random.split(key)
    params = init_params(k_params, in_channels=4, out_channels=32)
    x = jax.random.normal(k_x, (2, 4, 16, 16), jnp.float32)  # NCHW, like PyTorch

    fwd = jax.jit(functools.partial(double_conv_forward, params=params))
    out = fwd(x)
    jax.block_until_ready(out)
    assert out.shape == (2, 32, 16, 16)
    assert bool(jnp.isfinite(out).all())
    print("KERNEL_OK")
</pallas_src>

<mosaic_0001>
module attributes {stable_mosaic.version = 11 : i64} {
  func.func @_conv_stats_kernel(%arg0: i32, %arg1: i32, %arg2: i32, %arg3: memref<256x128xbf16, #tpu.memory_space<vmem>>, %arg4: memref<128x128xbf16, #tpu.memory_space<vmem>>, %arg5: memref<256x128xf32, #tpu.memory_space<vmem>>, %arg6: memref<1x1x128xf32, #tpu.memory_space<vmem>>, %arg7: memref<1x1x128xf32, #tpu.memory_space<vmem>>, %arg8: memref<256x128xf32, #tpu.memory_space<vmem>>) attributes {dimension_semantics = [#tpu.dimension_semantics<parallel>, #tpu.dimension_semantics<parallel>, #tpu.dimension_semantics<arbitrary>], iteration_bounds = array<i64: 2, 1, 1>, scalar_prefetch = 0 : i64, scratch_operands = 1 : i64, tpu.core_type = #tpu.core_type<tc>, window_params = [{transform_indices = @transform_0, window_bounds = array<i64: 256, 128>}, {transform_indices = @transform_1, window_bounds = array<i64: 128, 128>}, {transform_indices = @transform_2, window_bounds = array<i64: 256, 128>}, {transform_indices = @transform_3, window_bounds = array<i64: 1, 1, 128>}, {transform_indices = @transform_4, window_bounds = array<i64: 1, 1, 128>}]} {
    %c0_i32 = arith.constant 0 : i32
    %0 = arith.cmpi eq, %arg2, %c0_i32 : i32
    %1 = arith.extui %0 : i1 to i32
    %c0_i32_0 = arith.constant 0 : i32
    %2 = arith.cmpi ne, %1, %c0_i32_0 : i32
    scf.if %2 {
      %cst_10 = arith.constant 0.000000e+00 : f32
      %12 = vector.broadcast %cst_10 : f32 to vector<256x128xf32>
      %c0_11 = arith.constant 0 : index
      %c0_12 = arith.constant 0 : index
      %13 = vector.load %arg8[%c0_11, %c0_12] : memref<256x128xf32, #tpu.memory_space<vmem>>, vector<256x128xf32>
      tpu.vector_store %arg8[%c0_11, %c0_12], %12 {strides = array<i32>} : memref<256x128xf32, #tpu.memory_space<vmem>>, vector<256x128xf32>,
    } else {
    }
    %c0 = arith.constant 0 : index
    %c0_1 = arith.constant 0 : index
    %3 = vector.load %arg8[%c0, %c0_1] : memref<256x128xf32, #tpu.memory_space<vmem>>, vector<256x128xf32>
    %c0_2 = arith.constant 0 : index
    %c0_3 = arith.constant 0 : index
    %4 = vector.load %arg3[%c0_2, %c0_3] : memref<256x128xbf16, #tpu.memory_space<vmem>>, vector<256x128xbf16>
    %c0_4 = arith.constant 0 : index
    %c0_5 = arith.constant 0 : index
    %5 = vector.load %arg4[%c0_4, %c0_5] : memref<128x128xbf16, #tpu.memory_space<vmem>>, vector<128x128xbf16>
    %cst = arith.constant dense<0.000000e+00> : vector<256x128xf32>
    %6 = tpu.matmul %4, %5, %cst {dimension_numbers = #tpu.dot_dimension_numbers<[1], [0], [0], [1], [0, 0, 1, 1], [], []>} : vector<256x128xbf16>, vector<128x128xbf16>, vector<256x128xf32> -> vector<256x128xf32>
    %7 = arith.addf %3, %6 : vector<256x128xf32>
    %c0_6 = arith.constant 0 : index
    %c0_7 = arith.constant 0 : index
    %8 = vector.load %arg8[%c0_6, %c0_7] : memref<256x128xf32, #tpu.memory_space<vmem>>, vector<256x128xf32>
    tpu.vector_store %arg8[%c0_6, %c0_7], %7 {strides = array<i32>} : memref<256x128xf32, #tpu.memory_space<vmem>>, vector<256x128xf32>,
    %c0_i32_8 = arith.constant 0 : i32
    %9 = arith.cmpi eq, %arg2, %c0_i32_8 : i32
    %10 = arith.extui %9 : i1 to i32
    %c0_i32_9 = arith.constant 0 : i32
    %11 = arith.cmpi ne, %10, %c0_i32_9 : i32
    scf.if %11 {
      %c0_10 = arith.constant 0 : index
      %c0_11 = arith.constant 0 : index
      %12 = vector.load %arg8[%c0_10, %c0_11] : memref<256x128xf32, #tpu.memory_space<vmem>>, vector<256x128xf32>
      %c0_12 = arith.constant 0 : index
      %c0_13 = arith.constant 0 : index
      %13 = vector.load %arg5[%c0_12, %c0_13] : memref<256x128xf32, #tpu.memory_space<vmem>>, vector<256x128xf32>
      tpu.vector_store %arg5[%c0_12, %c0_13], %12 {strides = array<i32>} : memref<256x128xf32, #tpu.memory_space<vmem>>, vector<256x128xf32>,
      %cst_14 = arith.constant dense<0.000000e+00> : vector<128xf32>
      %14 = vector.multi_reduction <add>, %12, %cst_14 [0] : vector<256x128xf32> to vector<128xf32>
      %15 = vector.shape_cast %14 : vector<128xf32> to vector<1x128xf32>
      %16 = vector.shape_cast %15 : vector<1x128xf32> to vector<1x1x128xf32>
      %c0_15 = arith.constant 0 : index
      %c0_16 = arith.constant 0 : index
      %c0_17 = arith.constant 0 : index
      %17 = vector.load %arg6[%c0_15, %c0_16, %c0_17] : memref<1x1x128xf32, #tpu.memory_space<vmem>>, vector<1x1x128xf32>
      tpu.vector_store %arg6[%c0_15, %c0_16, %c0_17], %16 {strides = array<i32>} : memref<1x1x128xf32, #tpu.memory_space<vmem>>, vector<1x1x128xf32>,
      %18 = arith.mulf %12, %12 : vector<256x128xf32>
      %cst_18 = arith.constant dense<0.000000e+00> : vector<128xf32>
      %19 = vector.multi_reduction <add>, %18, %cst_18 [0] : vector<256x128xf32> to vector<128xf32>
      %20 = vector.shape_cast %19 : vector<128xf32> to vector<1x128xf32>
      %21 = vector.shape_cast %20 : vector<1x128xf32> to vector<1x1x128xf32>
      %c0_19 = arith.constant 0 : index
      %c0_20 = arith.constant 0 : index
      %c0_21 = arith.constant 0 : index
      %22 = vector.load %arg7[%c0_19, %c0_20, %c0_21] : memref<1x1x128xf32, #tpu.memory_space<vmem>>, vector<1x1x128xf32>
      tpu.vector_store %arg7[%c0_19, %c0_20, %c0_21], %21 {strides = array<i32>} : memref<1x1x128xf32, #tpu.memory_space<vmem>>, vector<1x1x128xf32>,
    } else {
    }
    return
  }
  func.func @transform_0(%arg0: i32, %arg1: i32, %arg2: i32) -> (i32, i32) {
    %c0_i32 = arith.constant 0 : i32
    return %arg0, %arg2 : i32, i32
  }
  func.func @transform_1(%arg0: i32, %arg1: i32, %arg2: i32) -> (i32, i32) {
    %c0_i32 = arith.constant 0 : i32
    return %arg2, %arg1 : i32, i32
  }
  func.func @transform_2(%arg0: i32, %arg1: i32, %arg2: i32) -> (i32, i32) {
    %c0_i32 = arith.constant 0 : i32
    return %arg0, %arg1 : i32, i32
  }
  func.func @transform_3(%arg0: i32, %arg1: i32, %arg2: i32) -> (i32, i32, i32) {
    %c0_i32 = arith.constant 0 : i32
    %c0_i32_0 = arith.constant 0 : i32
    return %arg0, %c0_i32, %arg1 : i32, i32, i32
  }
  func.func @transform_4(%arg0: i32, %arg1: i32, %arg2: i32) -> (i32, i32, i32) {
    %c0_i32 = arith.constant 0 : i32
    %c0_i32_0 = arith.constant 0 : i32
    return %arg0, %c0_i32, %arg1 : i32, i32, i32
  }
}

module attributes {stable_mosaic.version = 11 : i64} {
  func.func @_bn_relu_kernel(%arg0: i32, %arg1: i32, %arg2: memref<256x128xf32, #tpu.memory_space<vmem>>, %arg3: memref<1x128xf32, #tpu.memory_space<vmem>>, %arg4: memref<1x128xf32, #tpu.memory_space<vmem>>, %arg5: memref<256x128xf32, #tpu.memory_space<vmem>>) attributes {dimension_semantics = [#tpu.dimension_semantics<parallel>, #tpu.dimension_semantics<parallel>], iteration_bounds = array<i64: 2, 1>, scalar_prefetch = 0 : i64, scratch_operands = 0 : i64, tpu.core_type = #tpu.core_type<tc>, window_params = [{transform_indices = @transform_0, window_bounds = array<i64: 256, 128>}, {transform_indices = @transform_1, window_bounds = array<i64: 1, 128>}, {transform_indices = @transform_2, window_bounds = array<i64: 1, 128>}, {transform_indices = @transform_3, window_bounds = array<i64: 256, 128>}]} {
    %c0 = arith.constant 0 : index
    %c0_0 = arith.constant 0 : index
    %0 = vector.load %arg2[%c0, %c0_0] : memref<256x128xf32, #tpu.memory_space<vmem>>, vector<256x128xf32>
    %c0_1 = arith.constant 0 : index
    %c0_2 = arith.constant 0 : index
    %1 = vector.load %arg3[%c0_1, %c0_2] : memref<1x128xf32, #tpu.memory_space<vmem>>, vector<1x128xf32>
    %2 = vector.broadcast %1 : vector<1x128xf32> to vector<256x128xf32>
    %3 = arith.mulf %0, %2 : vector<256x128xf32>
    %c0_3 = arith.constant 0 : index
    %c0_4 = arith.constant 0 : index
    %4 = vector.load %arg4[%c0_3, %c0_4] : memref<1x128xf32, #tpu.memory_space<vmem>>, vector<1x128xf32>
    %5 = vector.broadcast %4 : vector<1x128xf32> to vector<256x128xf32>
    %6 = arith.addf %3, %5 : vector<256x128xf32>
    %cst = arith.constant 0.000000e+00 : f32
    %7 = vector.broadcast %cst : f32 to vector<256x128xf32>
    %8 = arith.maximumf %6, %7 : vector<256x128xf32>
    %c0_5 = arith.constant 0 : index
    %c0_6 = arith.constant 0 : index
    %9 = vector.load %arg5[%c0_5, %c0_6] : memref<256x128xf32, #tpu.memory_space<vmem>>, vector<256x128xf32>
    tpu.vector_store %arg5[%c0_5, %c0_6], %8 {strides = array<i32>} : memref<256x128xf32, #tpu.memory_space<vmem>>, vector<256x128xf32>,
    return
  }
  func.func @transform_0(%arg0: i32, %arg1: i32) -> (i32, i32) {
    %c0_i32 = arith.constant 0 : i32
    return %arg0, %arg1 : i32, i32
  }
  func.func @transform_1(%arg0: i32, %arg1: i32) -> (i32, i32) {
    %c0_i32 = arith.constant 0 : i32
    %c0_i32_0 = arith.constant 0 : i32
    return %c0_i32, %arg1 : i32, i32
  }
  func.func @transform_2(%arg0: i32, %arg1: i32) -> (i32, i32) {
    %c0_i32 = arith.constant 0 : i32
    %c0_i32_0 = arith.constant 0 : i32
    return %c0_i32, %arg1 : i32, i32
  }
  func.func @transform_3(%arg0: i32, %arg1: i32) -> (i32, i32) {
    %c0_i32 = arith.constant 0 : i32
    return %arg0, %arg1 : i32, i32
  }
}

module attributes {stable_mosaic.version = 11 : i64} {
  func.func @_conv_stats_kernel(%arg0: i32, %arg1: i32, %arg2: i32, %arg3: memref<256x128xbf16, #tpu.memory_space<vmem>>, %arg4: memref<128x128xbf16, #tpu.memory_space<vmem>>, %arg5: memref<256x128xf32, #tpu.memory_space<vmem>>, %arg6: memref<1x1x128xf32, #tpu.memory_space<vmem>>, %arg7: memref<1x1x128xf32, #tpu.memory_space<vmem>>, %arg8: memref<256x128xf32, #tpu.memory_space<vmem>>) attributes {dimension_semantics = [#tpu.dimension_semantics<parallel>, #tpu.dimension_semantics<parallel>, #tpu.dimension_semantics<arbitrary>], iteration_bounds = array<i64: 2, 1, 3>, scalar_prefetch = 0 : i64, scratch_operands = 1 : i64, tpu.core_type = #tpu.core_type<tc>, window_params = [{transform_indices = @transform_0, window_bounds = array<i64: 256, 128>}, {transform_indices = @transform_1, window_bounds = array<i64: 128, 128>}, {transform_indices = @transform_2, window_bounds = array<i64: 256, 128>}, {transform_indices = @transform_3, window_bounds = array<i64: 1, 1, 128>}, {transform_indices = @transform_4, window_bounds = array<i64: 1, 1, 128>}]} {
    %c0_i32 = arith.constant 0 : i32
    %0 = arith.cmpi eq, %arg2, %c0_i32 : i32
    %1 = arith.extui %0 : i1 to i32
    %c0_i32_0 = arith.constant 0 : i32
    %2 = arith.cmpi ne, %1, %c0_i32_0 : i32
    scf.if %2 {
      %cst_9 = arith.constant 0.000000e+00 : f32
      %12 = vector.broadcast %cst_9 : f32 to vector<256x128xf32>
      %c0_10 = arith.constant 0 : index
      %c0_11 = arith.constant 0 : index
      %13 = vector.load %arg8[%c0_10, %c0_11] : memref<256x128xf32, #tpu.memory_space<vmem>>, vector<256x128xf32>
      tpu.vector_store %arg8[%c0_10, %c0_11], %12 {strides = array<i32>} : memref<256x128xf32, #tpu.memory_space<vmem>>, vector<256x128xf32>,
    } else {
    }
    %c0 = arith.constant 0 : index
    %c0_1 = arith.constant 0 : index
    %3 = vector.load %arg8[%c0, %c0_1] : memref<256x128xf32, #tpu.memory_space<vmem>>, vector<256x128xf32>
    %c0_2 = arith.constant 0 : index
    %c0_3 = arith.constant 0 : index
    %4 = vector.load %arg3[%c0_2, %c0_3] : memref<256x128xbf16, #tpu.memory_space<vmem>>, vector<256x128xbf16>
    %c0_4 = arith.constant 0 : index
    %c0_5 = arith.constant 0 : index
    %5 = vector.load %arg4[%c0_4, %c0_5] : memref<128x128xbf16, #tpu.memory_space<vmem>>, vector<128x128xbf16>
    %cst = arith.constant dense<0.000000e+00> : vector<256x128xf32>
    %6 = tpu.matmul %4, %5, %cst {dimension_numbers = #tpu.dot_dimension_numbers<[1], [0], [0], [1], [0, 0, 1, 1], [], []>} : vector<256x128xbf16>, vector<128x128xbf16>, vector<256x128xf32> -> vector<256x128xf32>
    %7 = arith.addf %3, %6 : vector<256x128xf32>
    %c0_6 = arith.constant 0 : index
    %c0_7 = arith.constant 0 : index
    %8 = vector.load %arg8[%c0_6, %c0_7] : memref<256x128xf32, #tpu.memory_space<vmem>>, vector<256x128xf32>
    tpu.vector_store %arg8[%c0_6, %c0_7], %7 {strides = array<i32>} : memref<256x128xf32, #tpu.memory_space<vmem>>, vector<256x128xf32>,
    %c2_i32 = arith.constant 2 : i32
    %9 = arith.cmpi eq, %arg2, %c2_i32 : i32
    %10 = arith.extui %9 : i1 to i32
    %c0_i32_8 = arith.constant 0 : i32
    %11 = arith.cmpi ne, %10, %c0_i32_8 : i32
    scf.if %11 {
      %c0_9 = arith.constant 0 : index
      %c0_10 = arith.constant 0 : index
      %12 = vector.load %arg8[%c0_9, %c0_10] : memref<256x128xf32, #tpu.memory_space<vmem>>, vector<256x128xf32>
      %c0_11 = arith.constant 0 : index
      %c0_12 = arith.constant 0 : index
      %13 = vector.load %arg5[%c0_11, %c0_12] : memref<256x128xf32, #tpu.memory_space<vmem>>, vector<256x128xf32>
      tpu.vector_store %arg5[%c0_11, %c0_12], %12 {strides = array<i32>} : memref<256x128xf32, #tpu.memory_space<vmem>>, vector<256x128xf32>,
      %cst_13 = arith.constant dense<0.000000e+00> : vector<128xf32>
      %14 = vector.multi_reduction <add>, %12, %cst_13 [0] : vector<256x128xf32> to vector<128xf32>
      %15 = vector.shape_cast %14 : vector<128xf32> to vector<1x128xf32>
      %16 = vector.shape_cast %15 : vector<1x128xf32> to vector<1x1x128xf32>
      %c0_14 = arith.constant 0 : index
      %c0_15 = arith.constant 0 : index
      %c0_16 = arith.constant 0 : index
      %17 = vector.load %arg6[%c0_14, %c0_15, %c0_16] : memref<1x1x128xf32, #tpu.memory_space<vmem>>, vector<1x1x128xf32>
      tpu.vector_store %arg6[%c0_14, %c0_15, %c0_16], %16 {strides = array<i32>} : memref<1x1x128xf32, #tpu.memory_space<vmem>>, vector<1x1x128xf32>,
      %18 = arith.mulf %12, %12 : vector<256x128xf32>
      %cst_17 = arith.constant dense<0.000000e+00> : vector<128xf32>
      %19 = vector.multi_reduction <add>, %18, %cst_17 [0] : vector<256x128xf32> to vector<128xf32>
      %20 = vector.shape_cast %19 : vector<128xf32> to vector<1x128xf32>
      %21 = vector.shape_cast %20 : vector<1x128xf32> to vector<1x1x128xf32>
      %c0_18 = arith.constant 0 : index
      %c0_19 = arith.constant 0 : index
      %c0_20 = arith.constant 0 : index
      %22 = vector.load %arg7[%c0_18, %c0_19, %c0_20] : memref<1x1x128xf32, #tpu.memory_space<vmem>>, vector<1x1x128xf32>
      tpu.vector_store %arg7[%c0_18, %c0_19, %c0_20], %21 {strides = array<i32>} : memref<1x1x128xf32, #tpu.memory_space<vmem>>, vector<1x1x128xf32>,
    } else {
    }
    return
  }
  func.func @transform_0(%arg0: i32, %arg1: i32, %arg2: i32) -> (i32, i32) {
    %c0_i32 = arith.constant 0 : i32
    return %arg0, %arg2 : i32, i32
  }
  func.func @transform_1(%arg0: i32, %arg1: i32, %arg2: i32) -> (i32, i32) {
    %c0_i32 = arith.constant 0 : i32
    return %arg2, %arg1 : i32, i32
  }
  func.func @transform_2(%arg0: i32, %arg1: i32, %arg2: i32) -> (i32, i32) {
    %c0_i32 = arith.constant 0 : i32
    return %arg0, %arg1 : i32, i32
  }
  func.func @transform_3(%arg0: i32, %arg1: i32, %arg2: i32) -> (i32, i32, i32) {
    %c0_i32 = arith.constant 0 : i32
    %c0_i32_0 = arith.constant 0 : i32
    return %arg0, %c0_i32, %arg1 : i32, i32, i32
  }
  func.func @transform_4(%arg0: i32, %arg1: i32, %arg2: i32) -> (i32, i32, i32) {
    %c0_i32 = arith.constant 0 : i32
    %c0_i32_0 = arith.constant 0 : i32
    return %arg0, %c0_i32, %arg1 : i32, i32, i32
  }
}

module attributes {stable_mosaic.version = 11 : i64} {
  func.func @_bn_relu_kernel(%arg0: i32, %arg1: i32, %arg2: memref<256x128xf32, #tpu.memory_space<vmem>>, %arg3: memref<1x128xf32, #tpu.memory_space<vmem>>, %arg4: memref<1x128xf32, #tpu.memory_space<vmem>>, %arg5: memref<256x128xf32, #tpu.memory_space<vmem>>) attributes {dimension_semantics = [#tpu.dimension_semantics<parallel>, #tpu.dimension_semantics<parallel>], iteration_bounds = array<i64: 2, 1>, scalar_prefetch = 0 : i64, scratch_operands = 0 : i64, tpu.core_type = #tpu.core_type<tc>, window_params = [{transform_indices = @transform_0, window_bounds = array<i64: 256, 128>}, {transform_indices = @transform_1, window_bounds = array<i64: 1, 128>}, {transform_indices = @transform_2, window_bounds = array<i64: 1, 128>}, {transform_indices = @transform_3, window_bounds = array<i64: 256, 128>}]} {
    %c0 = arith.constant 0 : index
    %c0_0 = arith.constant 0 : index
    %0 = vector.load %arg2[%c0, %c0_0] : memref<256x128xf32, #tpu.memory_space<vmem>>, vector<256x128xf32>
    %c0_1 = arith.constant 0 : index
    %c0_2 = arith.constant 0 : index
    %1 = vector.load %arg3[%c0_1, %c0_2] : memref<1x128xf32, #tpu.memory_space<vmem>>, vector<1x128xf32>
    %2 = vector.broadcast %1 : vector<1x128xf32> to vector<256x128xf32>
    %3 = arith.mulf %0, %2 : vector<256x128xf32>
    %c0_3 = arith.constant 0 : index
    %c0_4 = arith.constant 0 : index
    %4 = vector.load %arg4[%c0_3, %c0_4] : memref<1x128xf32, #tpu.memory_space<vmem>>, vector<1x128xf32>
    %5 = vector.broadcast %4 : vector<1x128xf32> to vector<256x128xf32>
    %6 = arith.addf %3, %5 : vector<256x128xf32>
    %cst = arith.constant 0.000000e+00 : f32
    %7 = vector.broadcast %cst : f32 to vector<256x128xf32>
    %8 = arith.maximumf %6, %7 : vector<256x128xf32>
    %c0_5 = arith.constant 0 : index
    %c0_6 = arith.constant 0 : index
    %9 = vector.load %arg5[%c0_5, %c0_6] : memref<256x128xf32, #tpu.memory_space<vmem>>, vector<256x128xf32>
    tpu.vector_store %arg5[%c0_5, %c0_6], %8 {strides = array<i32>} : memref<256x128xf32, #tpu.memory_space<vmem>>, vector<256x128xf32>,
    return
  }
  func.func @transform_0(%arg0: i32, %arg1: i32) -> (i32, i32) {
    %c0_i32 = arith.constant 0 : i32
    return %arg0, %arg1 : i32, i32
  }
  func.func @transform_1(%arg0: i32, %arg1: i32) -> (i32, i32) {
    %c0_i32 = arith.constant 0 : i32
    %c0_i32_0 = arith.constant 0 : i32
    return %c0_i32, %arg1 : i32, i32
  }
  func.func @transform_2(%arg0: i32, %arg1: i32) -> (i32, i32) {
    %c0_i32 = arith.constant 0 : i32
    %c0_i32_0 = arith.constant 0 : i32
    return %c0_i32, %arg1 : i32, i32
  }
  func.func @transform_3(%arg0: i32, %arg1: i32) -> (i32, i32) {
    %c0_i32 = arith.constant 0 : i32
    return %arg0, %arg1 : i32, i32
  }
}

</mosaic_0001>

<bundles_post_ra>
// kernel: double_conv_forward.5
= control target key start
LH: loop header
LB: loop body
LE: loop exit
PB: predicated region body
PF: predicated region fallthrough
CT: control target
= control target key end

     0   :  { %s592_s12 = smov 0   ;;  %s594_s13 = smov 0   ;;  %s767_s0 = inlined_call_operand.vmem [shape: f32[512,128], index: 0, kind: input, shape index: {}]   ;;  %s768_s1 = inlined_call_operand.vmem [shape: f32[1,128], index: 1, kind: input, shape index: {}]   ;;  %s769_s2 = inlined_call_operand.vmem [shape: f32[1,128], index: 2, kind: input, shape index: {}]   ;;  %s770_s3 = inlined_call_operand.vmem [shape: f32[512,128], index: 3, kind: output, shape index: {}]  }
   0x1   :  { %s596_s14 = smov 0  }
   0x2 LB: > { %s25_s15 = sadd.s32 1, %s566_s13  ;;  %p515_p0 = scmp.ge.s32.totalorder %s570_s14, 1  ;;  %s570_s14 = sphi %s596_s14, %s13_s14   ;;  %s566_s13 = sphi %s594_s13, %s772_s13   ;;  %s562_s12 = sphi %s592_s12, %s771_s12  }
   0x3   : > { %p27_p1 = scmp.ge.s32.totalorder %s25_s15, 2  ;;  %p173_p2 = scmp.lt.s32.totalorder %s570_s14, 3 }
   0x5   : > { %s774_s15 = smov (%p27_p1, %s25_s15), 0  ;;  %p174_p3 = pnand %p515_p0, %p173_p2 }
   0x6   : > { %s516_s16 = sshll.u32 (!%p174_p3), %s562_s12, 5  ;;  %v613_v0 = vld [vmem:[%s768_s1] ss:$0 sm:$0xff] (!%p174_p3) }
   0x7   : > { %177 = sbr.rel (%p174_p3) target bundleno = 47 (0x2f), region = 32  ;;  %p210_p4 = scmp.lt.s32.totalorder (!%p174_p3), %s516_s16, 63  ;;  %v623_v1 = vld [vmem:[%s769_s2] ss:$0 sm:$0xff] (!%p174_p3) }
   0xe   : > { %s776_s16 = smov (!%p210_p4, %s516_s16), 63 }
   0xf   : > { %s517_s17 = sshll.u32 %s776_s16, 3 }
  0x10   : > { %s618_s22 = scalar_lea.vmem %s767_s0, %s517_s17  ;;  %s646_s27 = scalar_lea.vmem %s770_s3, %s517_s17 }
  0x11   : > { %v233_v2 = vld [vmem:[%s618_s22] sm:$0xff]  ;;  %v234_v3 = vld [vmem:[%s618_s22 + $0x8] sm:$0xff]  ;;  %v235_v4 = vld [vmem:[%s618_s22 + $0x10] sm:$0xff] }
  0x12   : > { %v272_v5 = vmul.f32 %v613_v0, %v233_v2  ;;  %v273_v6 = vmul.f32 %v613_v0, %v234_v3  ;;  %v274_v7 = vmul.f32 %v613_v0, %v235_v4  ;;  %v236_v8 = vld [vmem:[%s618_s22 + $0x18] sm:$0xff]  ;;  %v237_v9 = vld [vmem:[%s618_s22 + $0x20] sm:$0xff]  ;;  %v238_v10 = vld [vmem:[%s618_s22 + $0x28] sm:$0xff] }
  0x13   : > { %v275_v11 = vmul.f32 %v613_v0, %v236_v8  ;;  %v276_v12 = vmul.f32 %v613_v0, %v237_v9  ;;  %v277_v13 = vmul.f32 %v613_v0, %v238_v10  ;;  %v239_v14 = vld [vmem:[%s618_s22 + $0x30] sm:$0xff]  ;;  %v240_v15 = vld [vmem:[%s618_s22 + $0x38] sm:$0xff]  ;;  %v241_v24 = vld [vmem:[%s618_s22 + $0x40] sm:$0xff] }
  0x14   : > { %v311_v16 = vadd.f32 %v623_v1, %v272_v5  ;;  %v312_v17 = vadd.f32 %v623_v1, %v273_v6  ;;  %v313_v18 = vadd.f32 %v623_v1, %v274_v7  ;;  %v278_v19 = vmul.f32 %v613_v0, %v239_v14  ;;  %v242_v25 = vld [vmem:[%s618_s22 + $0x48] sm:$0xff]  ;;  %v243_v26 = vld [vmem:[%s618_s22 + $0x50] sm:$0xff]  ;;  %v244_v31 = vld [vmem:[%s618_s22 + $0x58] sm:$0xff] }
  0x15   : > { %v314_v20 = vadd.f32 %v623_v1, %v275_v11  ;;  %v315_v21 = vadd.f32 %v623_v1, %v276_v12  ;;  %v316_v22 = vadd.f32 %v623_v1, %v277_v13  ;;  %v279_v23 = vmul.f32 %v613_v0, %v240_v15  ;;  %v245_v32 = vld [vmem:[%s618_s22 + $0x60] sm:$0xff]  ;;  %v246_v33 = vld [vmem:[%s618_s22 + $0x68] sm:$0xff]  ;;  %v247_v38 = vld [vmem:[%s618_s22 + $0x70] sm:$0xff] }
  0x16   : > { %v343_v27 = vmax.f32 %v311_v16, 0.0  ;;  %v344_v28 = vmax.f32 %v312_v17, 0.0  ;;  %v345_v29 = vmax.f32 %v313_v18, 0.0  ;;  %v317_v30 = vadd.f32 %v623_v1, %v278_v19  ;;  %v248_v43 = vld [vmem:[%s618_s22 + $0x78] sm:$0xff]  ;;  %v249_v56 = vld [vmem:[%s618_s22 + $0x80] sm:$0xff]  ;;  %v250_v57 = vld [vmem:[%s618_s22 + $0x88] sm:$0xff] }
  0x17   : > { %v346_v34 = vmax.f32 %v314_v20, 0.0  ;;  %v347_v35 = vmax.f32 %v315_v21, 0.0  ;;  %v348_v36 = vmax.f32 %v316_v22, 0.0  ;;  %v318_v37 = vadd.f32 %v623_v1, %v279_v23  ;;  %v251_v58 = vld [vmem:[%s618_s22 + $0x90] sm:$0xff]  ;;  %v252_v63 = vld [vmem:[%s618_s22 + $0x98] sm:$0xff]  ;;  %v253_v2 = vld [vmem:[%s618_s22 + $0xa0] sm:$0xff] }
  0x18   : > { %375 = vst [vmem:[%s646_s27] sm:$0xff] %v343_v27  ;;  %376 = vst [vmem:[%s646_s27 + $0x8] sm:$0xff] %v344_v28  ;;  %v349_v39 = vmax.f32 %v317_v30, 0.0  ;;  %v280_v40 = vmul.f32 %v613_v0, %v241_v24  ;;  %v281_v41 = vmul.f32 %v613_v0, %v242_v25  ;;  %v282_v42 = vmul.f32 %v613_v0, %v243_v26  ;;  %v254_v3 = vld [vmem:[%s618_s22 + $0xa8] sm:$0xff]  ;;  %v255_v8 = vld [vmem:[%s618_s22 + $0xb0] sm:$0xff] }
  0x19   : > { %377 = vst [vmem:[%s646_s27 + $0x10] sm:$0xff] %v345_v29  ;;  %378 = vst [vmem:[%s646_s27 + $0x18] sm:$0xff] %v346_v34  ;;  %v350_v44 = vmax.f32 %v318_v37, 0.0  ;;  %v283_v45 = vmul.f32 %v613_v0, %v244_v31  ;;  %v284_v46 = vmul.f32 %v613_v0, %v245_v32  ;;  %v285_v47 = vmul.f32 %v613_v0, %v246_v33  ;;  %v256_v13 = vld [vmem:[%s618_s22 + $0xb8] sm:$0xff]  ;;  %v257_v26 = vld [vmem:[%s618_s22 + $0xc0] sm:$0xff] }
  0x1a   : > { %379 = vst [vmem:[%s646_s27 + $0x20] sm:$0xff] %v347_v35  ;;  %380 = vst [vmem:[%s646_s27 + $0x28] sm:$0xff] %v348_v36  ;;  %v319_v48 = vadd.f32 %v623_v1, %v280_v40  ;;  %v320_v49 = vadd.f32 %v623_v1, %v281_v41  ;;  %v321_v50 = vadd.f32 %v623_v1, %v282_v42  ;;  %v258_v27 = vld [vmem:[%s618_s22 + $0xc8] sm:$0xff]  ;;  %v259_v28 = vld [vmem:[%s618_s22 + $0xd0] sm:$0xff] }
  0x1b   : > { %381 = vst [vmem:[%s646_s27 + $0x30] sm:$0xff] %v349_v39  ;;  %v286_v51 = vmul.f32 %v613_v0, %v247_v38  ;;  %382 = vst [vmem:[%s646_s27 + $0x38] sm:$0xff] %v350_v44  ;;  %v322_v52 = vadd.f32 %v623_v1, %v283_v45  ;;  %v323_v53 = vadd.f32 %v623_v1, %v284_v46  ;;  %v260_v33 = vld [vmem:[%s618_s22 + $0xd8] sm:$0xff]  ;;  %v261_v34 = vld [vmem:[%s618_s22 + $0xe0] sm:$0xff] }
  0x1c   : > { %v324_v54 = vadd.f32 %v623_v1, %v285_v47  ;;  %v287_v55 = vmul.f32 %v613_v0, %v248_v43  ;;  %v351_v59 = vmax.f32 %v319_v48, 0.0  ;;  %v352_v60 = vmax.f32 %v320_v49, 0.0  ;;  %v262_v35 = vld [vmem:[%s618_s22 + $0xe8] sm:$0xff]  ;;  %v263_v40 = vld [vmem:[%s618_s22 + $0xf0] sm:$0xff]  ;;  %v264_v45 = vld [vmem:[%s618_s22 + $0xf8] sm:$0xff] }
  0x1d   : > { %v353_v61 = vmax.f32 %v321_v50, 0.0  ;;  %v325_v62 = vadd.f32 %v623_v1, %v286_v51  ;;  %v354_v4 = vmax.f32 %v322_v52, 0.0  ;;  %v355_v5 = vmax.f32 %v323_v53, 0.0 }
  0x1e   : > { %v356_v6 = vmax.f32 %v324_v54, 0.0  ;;  %v326_v7 = vadd.f32 %v623_v1, %v287_v55  ;;  %383 = vst [vmem:[%s646_s27 + $0x40] sm:$0xff] %v351_v59  ;;  %384 = vst [vmem:[%s646_s27 + $0x48] sm:$0xff] %v352_v60  ;;  %v288_v10 = vmul.f32 %v613_v0, %v249_v56  ;;  %v289_v11 = vmul.f32 %v613_v0, %v250_v57 }
  0x1f   : > { %385 = vst [vmem:[%s646_s27 + $0x50] sm:$0xff] %v353_v61  ;;  %v357_v9 = vmax.f32 %v325_v62, 0.0  ;;  %v290_v12 = vmul.f32 %v613_v0, %v251_v58  ;;  %386 = vst [vmem:[%s646_s27 + $0x58] sm:$0xff] %v354_v4  ;;  %v291_v15 = vmul.f32 %v613_v0, %v252_v63  ;;  %v292_v16 = vmul.f32 %v613_v0, %v253_v2 }
  0x20   : > { %387 = vst [vmem:[%s646_s27 + $0x60] sm:$0xff] %v355_v5  ;;  %388 = vst [vmem:[%s646_s27 + $0x68] sm:$0xff] %v356_v6  ;;  %v358_v14 = vmax.f32 %v326_v7, 0.0  ;;  %v293_v17 = vmul.f32 %v613_v0, %v254_v3  ;;  %v327_v18 = vadd.f32 %v623_v1, %v288_v10  ;;  %v328_v19 = vadd.f32 %v623_v1, %v289_v11 }
  0x21   : > { %389 = vst [vmem:[%s646_s27 + $0x70] sm:$0xff] %v357_v9  ;;  %v329_v20 = vadd.f32 %v623_v1, %v290_v12  ;;  %v294_v21 = vmul.f32 %v613_v0, %v255_v8  ;;  %v330_v22 = vadd.f32 %v623_v1, %v291_v15  ;;  %v331_v23 = vadd.f32 %v623_v1, %v292_v16 }
  0x22   : > { %390 = vst [vmem:[%s646_s27 + $0x78] sm:$0xff] %v358_v14  ;;  %v332_v24 = vadd.f32 %v623_v1, %v293_v17  ;;  %v295_v25 = vmul.f32 %v613_v0, %v256_v13  ;;  %v359_v29 = vmax.f32 %v327_v18, 0.0  ;;  %v360_v30 = vmax.f32 %v328_v19, 0.0 }
  0x23   : > { %v361_v31 = vmax.f32 %v329_v20, 0.0  ;;  %v333_v32 = vadd.f32 %v623_v1, %v294_v21  ;;  %v362_v36 = vmax.f32 %v330_v22, 0.0  ;;  %v363_v37 = vmax.f32 %v331_v23, 0.0 }
  0x24   : > { %v364_v38 = vmax.f32 %v332_v24, 0.0  ;;  %v334_v39 = vadd.f32 %v623_v1, %v295_v25  ;;  %391 = vst [vmem:[%s646_s27 + $0x80] sm:$0xff] %v359_v29  ;;  %392 = vst [vmem:[%s646_s27 + $0x88] sm:$0xff] %v360_v30  ;;  %v296_v42 = vmul.f32 %v613_v0, %v257_v26  ;;  %v297_v43 = vmul.f32 %v613_v0, %v258_v27 }
  0x25   : > { %393 = vst [vmem:[%s646_s27 + $0x90] sm:$0xff] %v361_v31  ;;  %v365_v41 = vmax.f32 %v333_v32, 0.0  ;;  %v298_v44 = vmul.f32 %v613_v0, %v259_v28  ;;  %394 = vst [vmem:[%s646_s27 + $0x98] sm:$0xff] %v362_v36  ;;  %v299_v47 = vmul.f32 %v613_v0, %v260_v33  ;;  %v300_v48 = vmul.f32 %v613_v0, %v261_v34 }
  0x26   : > { %395 = vst [vmem:[%s646_s27 + $0xa0] sm:$0xff] %v363_v37  ;;  %396 = vst [vmem:[%s646_s27 + $0xa8] sm:$0xff] %v364_v38  ;;  %v366_v46 = vmax.f32 %v334_v39, 0.0  ;;  %v301_v49 = vmul.f32 %v613_v0, %v262_v35  ;;  %v335_v50 = vadd.f32 %v623_v1, %v296_v42  ;;  %v336_v51 = vadd.f32 %v623_v1, %v297_v43 }
  0x27   : > { %397 = vst [vmem:[%s646_s27 + $0xb0] sm:$0xff] %v365_v41  ;;  %v337_v52 = vadd.f32 %v623_v1, %v298_v44  ;;  %v302_v53 = vmul.f32 %v613_v0, %v263_v40  ;;  %v338_v54 = vadd.f32 %v623_v1, %v299_v47  ;;  %v339_v55 = vadd.f32 %v623_v1, %v300_v48 }
  0x28   : > { %398 = vst [vmem:[%s646_s27 + $0xb8] sm:$0xff] %v366_v46  ;;  %v340_v56 = vadd.f32 %v623_v1, %v301_v49  ;;  %v303_v57 = vmul.f32 %v613_v0, %v264_v45  ;;  %v367_v58 = vmax.f32 %v335_v50, 0.0  ;;  %v368_v59 = vmax.f32 %v336_v51, 0.0 }
  0x29   : > { %v369_v60 = vmax.f32 %v337_v52, 0.0  ;;  %v341_v61 = vadd.f32 %v623_v1, %v302_v53  ;;  %v370_v62 = vmax.f32 %v338_v54, 0.0  ;;  %v371_v63 = vmax.f32 %v339_v55, 0.0 }
  0x2a   : > { %v372_v2 = vmax.f32 %v340_v56, 0.0  ;;  %v342_v3 = vadd.f32 %v623_v1, %v303_v57  ;;  %399 = vst [vmem:[%s646_s27 + $0xc0] sm:$0xff] %v367_v58  ;;  %400 = vst [vmem:[%s646_s27 + $0xc8] sm:$0xff] %v368_v59 }
  0x2b   : > { %401 = vst [vmem:[%s646_s27 + $0xd0] sm:$0xff] %v369_v60  ;;  %v373_v4 = vmax.f32 %v341_v61, 0.0  ;;  %402 = vst [vmem:[%s646_s27 + $0xd8] sm:$0xff] %v370_v62 }
  0x2c   : > { %403 = vst [vmem:[%s646_s27 + $0xe0] sm:$0xff] %v371_v63  ;;  %404 = vst [vmem:[%s646_s27 + $0xe8] sm:$0xff] %v372_v2  ;;  %v374_v0 = vmax.f32 %v342_v3, 0.0 }
  0x2d   : > { %405 = vst [vmem:[%s646_s27 + $0xf0] sm:$0xff] %v373_v4 }
  0x2e   : > { %406 = vst [vmem:[%s646_s27 + $0xf8] sm:$0xff] %v374_v0 }
  0x2f PF: > { %s13_s14 = sadd.s32 1, %s570_s14   ;;  %s771_s12 = smov %s566_s13 }
  0x30   : > { %p10_p5 = scmp.ge.s32.totalorder %s13_s14, 4   ;;  %s772_s13 = smov %s774_s15 }
  0x32   :  { %12 = sbr.rel (!%p10_p5) target bundleno = 2 (0x2), region = 68 }

// kernel: double_conv_forward.4
= control target key start
LH: loop header
LB: loop body
LE: loop exit
PB: predicated region body
PF: predicated region fallthrough
CT: control target
= control target key end

     0   :  { %s1356_s15 = smov 0   ;;  %s1358_s16 = smov 0   ;;  %s1558_s0 = inlined_call_operand.vmem [shape: bf16[512,128], index: 0, kind: input, shape index: {}]   ;;  %s1559_s1 = inlined_call_operand.vmem [shape: bf16[128,128], index: 1, kind: input, shape index: {}]   ;;  %s1560_s2 = inlined_call_operand.vmem [shape: f32[512,128], index: 2, kind: output, shape index: {0}]   ;;  %s1561_s3 = inlined_call_operand.vmem [shape: f32[2,1,128], index: 3, kind: output, shape index: {1}]   ;;  %s1562_s4 = inlined_call_operand.vmem [shape: f32[2,1,128], index: 4, kind: output, shape index: {2}]  }
   0x1   :  { %s1360_s17 = smov 0  }
   0x2 LB: > { %s34_s18 = sadd.s32 1, %s1325_s16  ;;  %p1140_p0 = scmp.ge.s32.totalorder %s1329_s17, 1  ;;  %s1329_s17 = sphi %s1360_s17, %s15_s17   ;;  %s1325_s16 = sphi %s1358_s16, %s1564_s16   ;;  %s1321_s15 = sphi %s1356_s15, %s1563_s15  }
   0x3   : > { %p36_p1 = scmp.ge.s32.totalorder %s34_s18, 2  ;;  %p214_p2 = scmp.lt.s32.totalorder %s1329_s17, 3 }
   0x5   : > { %s1566_s18 = smov (%p36_p1, %s34_s18), 0  ;;  %p215_p3 = pnand %p1140_p0, %p214_p2 }
   0x6   : > { %v1283_v0 = vld [vmem:[%s1559_s1] sm:$0xff] (!%p215_p3)   ;;  %s1141_s21 = sshll.u32 (!%p215_p3), %s1321_s15, 5  ;;  %v1284_v1 = vld [vmem:[%s1559_s1 + $0x8] sm:$0xff] (!%p215_p3)   ;;  %v1285_v2 = vld [vmem:[%s1559_s1 + $0x10] sm:$0xff] (!%p215_p3)   ;;  %p293_p5 = scmp.lt.s32.totalorder (!%p215_p3), %s1321_s15, 1 }
   0x7   : > { %218 = sbr.rel (%p215_p3) target bundleno = 331 (0x14b), region = 28  ;;  %p267_p4 = scmp.lt.s32.totalorder (!%p215_p3), %s1141_s21, 63  ;;  %1195 = vmatprep.subr.bf16.mxu0 (!%p215_p3), %v1283_v0  ;;  %1243 = vmatprep.subr.bf16.mxu1 (!%p215_p3), %v1283_v0  ;;  %v1286_v3 = vld [vmem:[%s1559_s1 + $0x18] sm:$0xff] (!%p215_p3)   ;;  %v1287_v5 = vld [vmem:[%s1559_s1 + $0x20] sm:$0xff] (!%p215_p3)   ;;  %v1288_v6 = vld [vmem:[%s1559_s1 + $0x28] sm:$0xff] (!%p215_p3)  }
   0x8   : > { %1196 = vmatpush3.bf16.msra.mxu0 (!%p215_p3), %v1283_v0  ;;  %1251 = vmatpush3.bf16.msra.mxu1 (!%p215_p3), %v1283_v0  ;;  %v1289_v8 = vld [vmem:[%s1559_s1 + $0x30] sm:$0xff] (!%p215_p3)   ;;  %v1290_v9 = vld [vmem:[%s1559_s1 + $0x38] sm:$0xff] (!%p215_p3)  }
   0x9   : > { %1197 = vmatprep.subr.bf16.mxu0 (!%p215_p3), %v1284_v1  ;;  %1244 = vmatprep.subr.bf16.mxu1 (!%p215_p3), %v1284_v1 }
   0xc   : > { %1198 = vmatpush3.bf16.msra.mxu0 (!%p215_p3), %v1284_v1  ;;  %1252 = vmatpush3.bf16.msra.mxu1 (!%p215_p3), %v1284_v1 }
   0xd   : > { %1199 = vmatprep.subr.bf16.mxu0 (!%p215_p3), %v1285_v2  ;;  %1245 = vmatprep.subr.bf16.mxu1 (!%p215_p3), %v1285_v2 }
   0xe   : > { %s1568_s21 = smov (!%p267_p4, %s1141_s21), 63  ;;  %s1570_s15 = smov (!%p293_p5, %s1321_s15), 1 }
   0xf   : > { %s1142_s26 = sshll.u32 %s1568_s21, 2  ;;  %s1144_s14 = sshll.u32 %s1568_s21, 3 }
  0x10   : > { %s1392_s29 = scalar_lea.vmem %s1558_s0, %s1142_s26  ;;  %1200 = vmatpush3.bf16.msra.mxu0 %v1285_v2  ;;  %1253 = vmatpush3.bf16.msra.mxu1 %v1285_v2  ;;  %s1429_s22 = scalar_lea.vmem %s1560_s2, %s1144_s14 }
  0x11   : > { %v1291_v4 = vld [vmem:[%s1392_s29] sm:$0xff]   ;;  %1201 = vmatprep.subr.bf16.mxu0 %v1286_v3  ;;  %1246 = vmatprep.subr.bf16.mxu1 %v1286_v3  ;;  %v1292_v10 = vld [vmem:[%s1392_s29 + $0x8] sm:$0xff]   ;;  %v1293_v12 = vld [vmem:[%s1392_s29 + $0x10] sm:$0xff]   ;;  %s298_s24 = scalar_lea.vmem %s1561_s3, %s1570_s15  ;;  %s304_s27 = scalar_lea.vmem %s1562_s4, %s1570_s15 }
  0x12   : > { %1211 = vmatprep.mubr.bf16.mxu0 %v1291_v4  ;;  %v1299_v7 = vld [vmem:[%s1392_s29 + $0x40] sm:$0xff]   ;;  %v1300_v11 = vld [vmem:[%s1392_s29 + $0x48] sm:$0xff]   ;;  %v1301_v13 = vld [vmem:[%s1392_s29 + $0x50] sm:$0xff]  }
  0x13   : > { %1227 = vmatprep.mubr.bf16.mxu1 %v1299_v7  ;;  %v1294_v14 = vld [vmem:[%s1392_s29 + $0x18] sm:$0xff]   ;;  %v1295_v16 = vld [vmem:[%s1392_s29 + $0x20] sm:$0xff]   ;;  %v1296_v18 = vld [vmem:[%s1392_s29 + $0x28] sm:$0xff]  }
  0x14   : > { %1202 = vmatpush3.bf16.msra.mxu0 %v1286_v3  ;;  %1254 = vmatpush3.bf16.msra.mxu1 %v1286_v3  ;;  %v1302_v15 = vld [vmem:[%s1392_s29 + $0x58] sm:$0xff]   ;;  %v1303_v17 = vld [vmem:[%s1392_s29 + $0x60] sm:$0xff]   ;;  %v1304_v19 = vld [vmem:[%s1392_s29 + $0x68] sm:$0xff]  }
  0x15   : > { %1203 = vmatprep.subr.bf16.mxu0 %v1287_v5  ;;  %1247 = vmatprep.subr.bf16.mxu1 %v1287_v5  ;;  %v1297_v20 = vld [vmem:[%s1392_s29 + $0x30] sm:$0xff]   ;;  %v1298_v22 = vld [vmem:[%s1392_s29 + $0x38] sm:$0xff]  }
  0x16   : > { %v1305_v21 = vld [vmem:[%s1392_s29 + $0x70] sm:$0xff]   ;;  %v1306_v23 = vld [vmem:[%s1392_s29 + $0x78] sm:$0xff]  }
  0x18   : > { %1204 = vmatpush3.bf16.msra.mxu0 %v1287_v5  ;;  %1255 = vmatpush3.bf16.msra.mxu1 %v1287_v5 }
  0x19   : > { %1205 = vmatprep.subr.bf16.mxu0 %v1288_v6  ;;  %1248 = vmatprep.subr.bf16.mxu1 %v1288_v6 }
  0x1c   : > { %1206 = vmatpush3.bf16.msra.mxu0 %v1288_v6  ;;  %1256 = vmatpush3.bf16.msra.mxu1 %v1288_v6 }
  0x1d   : > { %1207 = vmatprep.subr.bf16.mxu0 %v1289_v8  ;;  %1249 = vmatprep.subr.bf16.mxu1 %v1289_v8 }
  0x20   : > { %1208 = vmatpush3.bf16.msra.mxu0 %v1289_v8  ;;  %1257 = vmatpush3.bf16.msra.mxu1 %v1289_v8 }
  0x21   : > { %1209 = vmatprep.subr.bf16.mxu0 %v1290_v9  ;;  %1250 = vmatprep.subr.bf16.mxu1 %v1290_v9 }
  0x24   : > { %1210 = vmatpush3.bf16.msra.mxu0 %v1290_v9  ;;  %1258 = vmatpush3.bf16.msra.mxu1 %v1290_v9 }
  0x27   : > { %1212 = vmatmul.mubr.bf16.vlgmr.msra.gmra.mrb[0].mxu0 %v1292_v10  ;;  %1228 = vmatmul.mubr.bf16.vlgmr.msra.gmra.mrb[0].mxu1 %v1300_v11 }
  0x28   : > { %1215 = vmatprep.mubr.bf16.mxu0 %v1293_v12  ;;  %1231 = vmatprep.mubr.bf16.mxu1 %v1301_v13 }
  0x2f   : > { %1216 = vmatmul.mubr.bf16.gmra.mrb[4].mxu0 %v1294_v14  ;;  %1232 = vmatmul.mubr.bf16.gmra.mrb[4].mxu1 %v1302_v15 }
  0x30   : > { %1219 = vmatprep.mubr.bf16.mxu0 %v1295_v16  ;;  %1235 = vmatprep.mubr.bf16.mxu1 %v1303_v17 }
  0x37   : > { %1220 = vmatmul.mubr.bf16.gmra.mrb[8].mxu0 %v1296_v18  ;;  %1236 = vmatmul.mubr.bf16.gmra.mrb[8].mxu1 %v1304_v19 }
  0x38   : > { %1223 = vmatprep.mubr.bf16.mxu0 %v1297_v20  ;;  %1239 = vmatprep.mubr.bf16.mxu1 %v1305_v21 }
  0x3f   : > { %1224 = vmatmul.mubr.bf16.gmra.mrb[12].mxu0 %v1298_v22  ;;  %1240 = vmatmul.mubr.bf16.gmra.mrb[12].mxu1 %v1306_v23 }
  0xfa   : > { %v1213_v24 = vpop.f32.mrb[0].mxu0  ;;  %v1431_v25 = vpop.f32.mrb[0].mxu1 }
  0xfb   : > { %828 = vst [vmem:[%s1429_s22 + $0x10] sm:$0xff] %v1213_v24  ;;  %v600_v26 = vpop.f32.mrb[1].mxu0  ;;  %844 = vst [vmem:[%s1429_s22 + $0x90] sm:$0xff] %v1431_v25  ;;  %v1436_v27 = vpop.f32.mrb[1].mxu1  ;;  %v898_v35 = vmul.f32 %v1213_v24, %v1213_v24 }
  0xfc   : > { %826 = vst [vmem:[%s1429_s22] sm:$0xff] %v600_v26  ;;  %v1214_v28 = vpop.f32.mrb[2].mxu0  ;;  %842 = vst [vmem:[%s1429_s22 + $0x80] sm:$0xff] %v1436_v27  ;;  %v1441_v29 = vpop.f32.mrb[2].mxu1  ;;  %v896_v32 = vmul.f32 %v600_v26, %v600_v26 }
  0xfd   : > { %829 = vst [vmem:[%s1429_s22 + $0x18] sm:$0xff] %v1214_v28  ;;  %v603_v30 = vpop.f32.mrb[3].mxu0  ;;  %845 = vst [vmem:[%s1429_s22 + $0x98] sm:$0xff] %v1441_v29  ;;  %v1446_v31 = vpop.f32.mrb[3].mxu1  ;;  %v899_v38 = vmul.f32 %v1214_v28, %v1214_v28 }
  0xfe   : > { %827 = vst [vmem:[%s1429_s22 + $0x8] sm:$0xff] %v603_v30  ;;  %v858_v33 = vadd.f32 %v603_v30, %v600_v26  ;;  %v897_v34 = vmul.f32 %v603_v30, %v603_v30  ;;  %843 = vst [vmem:[%s1429_s22 + $0x88] sm:$0xff] %v1446_v31 }
 0x100   : > { %v859_v36 = vadd.f32 %v1213_v24, %v858_v33  ;;  %v928_v37 = vadd.f32 %v897_v34, %v896_v32 }
 0x102   : > { %v929_v39 = vadd.f32 %v928_v37, %v898_v35  ;;  %v1217_v40 = vpop.f32.mrb[4].mxu0  ;;  %v860_v41 = vadd.f32 %v1214_v28, %v859_v36  ;;  %v1451_v42 = vpop.f32.mrb[4].mxu1 }
 0x103   : > { %832 = vst [vmem:[%s1429_s22 + $0x30] sm:$0xff] %v1217_v40  ;;  %v616_v43 = vpop.f32.mrb[5].mxu0  ;;  %848 = vst [vmem:[%s1429_s22 + $0xb0] sm:$0xff] %v1451_v42  ;;  %v1456_v44 = vpop.f32.mrb[5].mxu1  ;;  %v902_v55 = vmul.f32 %v1217_v40, %v1217_v40 }
 0x104   : > { %830 = vst [vmem:[%s1429_s22 + $0x20] sm:$0xff] %v616_v43  ;;  %v861_v45 = vadd.f32 %v860_v41, %v616_v43  ;;  %v900_v46 = vmul.f32 %v616_v43, %v616_v43  ;;  %v930_v47 = vadd.f32 %v929_v39, %v899_v38  ;;  %v1218_v48 = vpop.f32.mrb[6].mxu0  ;;  %846 = vst [vmem:[%s1429_s22 + $0xa0] sm:$0xff] %v1456_v44  ;;  %v1461_v49 = vpop.f32.mrb[6].mxu1 }
 0x105   : > { %833 = vst [vmem:[%s1429_s22 + $0x38] sm:$0xff] %v1218_v48  ;;  %v619_v50 = vpop.f32.mrb[7].mxu0  ;;  %849 = vst [vmem:[%s1429_s22 + $0xb8] sm:$0xff] %v1461_v49  ;;  %v1466_v51 = vpop.f32.mrb[7].mxu1  ;;  %v903_v58 = vmul.f32 %v1218_v48, %v1218_v48  ;;  %v912_v41 = vmul.f32 %v1436_v27, %v1436_v27 }
 0x106   : > { %v931_v52 = vadd.f32 %v930_v47, %v900_v46  ;;  %831 = vst [vmem:[%s1429_s22 + $0x28] sm:$0xff] %v619_v50  ;;  %v862_v53 = vadd.f32 %v861_v45, %v619_v50  ;;  %v901_v54 = vmul.f32 %v619_v50, %v619_v50  ;;  %847 = vst [vmem:[%s1429_s22 + $0xa8] sm:$0xff] %v1466_v51 }
 0x107   : > { %v914_v50 = vmul.f32 %v1431_v25, %v1431_v25 }
 0x108   : > { %v863_v56 = vadd.f32 %v1217_v40, %v862_v53  ;;  %v932_v57 = vadd.f32 %v931_v52, %v901_v54  ;;  %v915_v54 = vmul.f32 %v1441_v29, %v1441_v29 }
 0x10a   : > { %v933_v59 = vadd.f32 %v932_v57, %v902_v55  ;;  %v1221_v60 = vpop.f32.mrb[8].mxu0  ;;  %v864_v61 = vadd.f32 %v1218_v48, %v863_v56  ;;  %v1471_v62 = vpop.f32.mrb[8].mxu1  ;;  %v913_v48 = vmul.f32 %v1446_v31, %v1446_v31 }
 0x10b   : > { %836 = vst [vmem:[%s1429_s22 + $0x50] sm:$0xff] %v1221_v60  ;;  %v632_v63 = vpop.f32.mrb[9].mxu0  ;;  %852 = vst [vmem:[%s1429_s22 + $0xd0] sm:$0xff] %v1471_v62  ;;  %v1476_v0 = vpop.f32.mrb[9].mxu1  ;;  %v906_v11 = vmul.f32 %v1221_v60, %v1221_v60 }
 0x10c   : > { %834 = vst [vmem:[%s1429_s22 + $0x40] sm:$0xff] %v632_v63  ;;  %v865_v1 = vadd.f32 %v864_v61, %v632_v63  ;;  %v904_v2 = vmul.f32 %v632_v63, %v632_v63  ;;  %v934_v3 = vadd.f32 %v933_v59, %v903_v58  ;;  %v1222_v4 = vpop.f32.mrb[10].mxu0  ;;  %850 = vst [vmem:[%s1429_s22 + $0xc0] sm:$0xff] %v1476_v0  ;;  %v1481_v5 = vpop.f32.mrb[10].mxu1 }
 0x10d   : > { %837 = vst [vmem:[%s1429_s22 + $0x58] sm:$0xff] %v1222_v4  ;;  %v635_v6 = vpop.f32.mrb[11].mxu0  ;;  %853 = vst [vmem:[%s1429_s22 + $0xd8] sm:$0xff] %v1481_v5  ;;  %v1486_v7 = vpop.f32.mrb[11].mxu1  ;;  %v907_v14 = vmul.f32 %v1222_v4, %v1222_v4 }
 0x10e   : > { %v935_v8 = vadd.f32 %v934_v3, %v904_v2  ;;  %835 = vst [vmem:[%s1429_s22 + $0x48] sm:$0xff] %v635_v6  ;;  %v866_v9 = vadd.f32 %v865_v1, %v635_v6  ;;  %v905_v10 = vmul.f32 %v635_v6, %v635_v6  ;;  %851 = vst [vmem:[%s1429_s22 + $0xc8] sm:$0xff] %v1486_v7 }
 0x110   : > { %v867_v12 = vadd.f32 %v1221_v60, %v866_v9  ;;  %v936_v13 = vadd.f32 %v935_v8, %v905_v10  ;;  %v917_v60 = vmul.f32 %v1466_v51, %v1466_v51  ;;  %v921_v8 = vmul.f32 %v1486_v7, %v1486_v7 }
 0x112   : > { %v937_v15 = vadd.f32 %v936_v13, %v906_v11  ;;  %v1225_v16 = vpop.f32.mrb[12].mxu0  ;;  %v868_v17 = vadd.f32 %v1222_v4, %v867_v12  ;;  %v1491_v18 = vpop.f32.mrb[12].mxu1 }
 0x113   : > { %840 = vst [vmem:[%s1429_s22 + $0x70] sm:$0xff] %v1225_v16  ;;  %v648_v19 = vpop.f32.mrb[13].mxu0  ;;  %856 = vst [vmem:[%s1429_s22 + $0xf0] sm:$0xff] %v1491_v18  ;;  %v712_v20 = vpop.f32.mrb[13].mxu1  ;;  %v910_v35 = vmul.f32 %v1225_v16, %v1225_v16 }
 0x114   : > { %838 = vst [vmem:[%s1429_s22 + $0x60] sm:$0xff] %v648_v19  ;;  %v869_v21 = vadd.f32 %v868_v17, %v648_v19  ;;  %v908_v22 = vmul.f32 %v648_v19, %v648_v19  ;;  %v938_v23 = vadd.f32 %v937_v15, %v907_v14  ;;  %v1226_v24 = vpop.f32.mrb[14].mxu0  ;;  %854 = vst [vmem:[%s1429_s22 + $0xe0] sm:$0xff] %v712_v20  ;;  %v1242_v26 = vpop.f32.mrb[14].mxu1 }
 0x115   : > { %841 = vst [vmem:[%s1429_s22 + $0x78] sm:$0xff] %v1226_v24  ;;  %v651_v28 = vpop.f32.mrb[15].mxu0  ;;  %857 = vst [vmem:[%s1429_s22 + $0xf8] sm:$0xff] %v1242_v26  ;;  %v715_v30 = vpop.f32.mrb[15].mxu1  ;;  %v911_v38 = vmul.f32 %v1226_v24, %v1226_v24  ;;  %v924_v12 = vmul.f32 %v712_v20, %v712_v20  ;;  %v926_v17 = vmul.f32 %v1491_v18, %v1491_v18 }
 0x116   : > { %v939_v32 = vadd.f32 %v938_v23, %v908_v22  ;;  %839 = vst [vmem:[%s1429_s22 + $0x68] sm:$0xff] %v651_v28  ;;  %v870_v33 = vadd.f32 %v869_v21, %v651_v28  ;;  %v909_v34 = vmul.f32 %v651_v28, %v651_v28  ;;  %855 = vst [vmem:[%s1429_s22 + $0xe8] sm:$0xff] %v715_v30 }
 0x117   : > { %v927_v21 = vmul.f32 %v1242_v26, %v1242_v26 }
 0x118   : > { %v871_v36 = vadd.f32 %v1225_v16, %v870_v33  ;;  %v940_v37 = vadd.f32 %v939_v32, %v909_v34 }
 0x11a   : > { %v941_v39 = vadd.f32 %v940_v37, %v910_v35  ;;  %v872_v40 = vadd.f32 %v1226_v24, %v871_v36 }
 0x11c   : > { %v873_v43 = vadd.f32 %v872_v40, %v1436_v27  ;;  %v942_v45 = vadd.f32 %v941_v39, %v911_v38  ;;  %v916_v27 = vmul.f32 %v1456_v44, %v1456_v44 }
 0x11e   : > { %v943_v46 = vadd.f32 %v942_v45, %v912_v41  ;;  %v874_v47 = vadd.f32 %v873_v43, %v1446_v31 }
 0x120   : > { %v875_v52 = vadd.f32 %v1431_v25, %v874_v47  ;;  %v944_v53 = vadd.f32 %v943_v46, %v913_v48  ;;  %v918_v25 = vmul.f32 %v1451_v42, %v1451_v42 }
 0x122   : > { %v945_v55 = vadd.f32 %v944_v53, %v914_v50  ;;  %v876_v56 = vadd.f32 %v1441_v29, %v875_v52  ;;  %v919_v29 = vmul.f32 %v1461_v49, %v1461_v49 }
 0x124   : > { %v877_v57 = vadd.f32 %v876_v56, %v1456_v44  ;;  %v946_v58 = vadd.f32 %v945_v55, %v915_v54  ;;  %v920_v44 = vmul.f32 %v1476_v0, %v1476_v0 }
 0x126   : > { %v947_v59 = vadd.f32 %v946_v58, %v916_v27  ;;  %v878_v31 = vadd.f32 %v877_v57, %v1466_v51 }
 0x128   : > { %v879_v61 = vadd.f32 %v1451_v42, %v878_v31  ;;  %v948_v63 = vadd.f32 %v947_v59, %v917_v60  ;;  %v922_v42 = vmul.f32 %v1471_v62, %v1471_v62 }
 0x12a   : > { %v949_v1 = vadd.f32 %v948_v63, %v918_v25  ;;  %v880_v2 = vadd.f32 %v1461_v49, %v879_v61  ;;  %v923_v49 = vmul.f32 %v1481_v5, %v1481_v5 }
 0x12c   : > { %v881_v3 = vadd.f32 %v880_v2, %v1476_v0  ;;  %v950_v4 = vadd.f32 %v949_v1, %v919_v29 }
 0x12e   : > { %v951_v6 = vadd.f32 %v950_v4, %v920_v44  ;;  %v882_v51 = vadd.f32 %v881_v3, %v1486_v7  ;;  %v925_v7 = vmul.f32 %v715_v30, %v715_v30 }
 0x130   : > { %v883_v9 = vadd.f32 %v1471_v62, %v882_v51  ;;  %v952_v10 = vadd.f32 %v951_v6, %v921_v8 }
 0x132   : > { %v953_v11 = vadd.f32 %v952_v10, %v922_v42  ;;  %v884_v0 = vadd.f32 %v1481_v5, %v883_v9 }
 0x134   : > { %v885_v13 = vadd.f32 %v884_v0, %v712_v20  ;;  %v954_v14 = vadd.f32 %v953_v11, %v923_v49 }
 0x136   : > { %v955_v15 = vadd.f32 %v954_v14, %v924_v12  ;;  %v886_v16 = vadd.f32 %v885_v13, %v715_v30 }
 0x138   : > { %v887_v62 = vadd.f32 %v1491_v18, %v886_v16  ;;  %v956_v19 = vadd.f32 %v955_v15, %v925_v7 }
 0x13a   : > { %v888_v22 = vadd.f32 %v1242_v26, %v887_v62  ;;  %v957_v23 = vadd.f32 %v956_v19, %v926_v17 }
 0x13c   : > { %v889_v24 = vrot.slane %v888_v22, 4  ;;  %v958_v28 = vadd.f32 %v957_v23, %v927_v21 }
 0x13e   : > { %v890_v5 = vadd.f32 %v889_v24, %v888_v22  ;;  %v959_v32 = vrot.slane %v958_v28, 4 }
 0x140   : > { %v891_v20 = vrot.slane %v890_v5, 2  ;;  %v960_v33 = vadd.f32 %v959_v32, %v958_v28 }
 0x142   : > { %v892_v34 = vadd.f32 %v891_v20, %v890_v5  ;;  %v961_v35 = vrot.slane %v960_v33, 2 }
 0x144   : > { %v893_v30 = vrot.slane %v892_v34, 1  ;;  %v962_v36 = vadd.f32 %v961_v35, %v960_v33 }
 0x146   : > { %v894_v18 = vadd.f32 %v893_v30, %v892_v34  ;;  %v963_v37 = vrot.slane %v962_v36, 1 }
 0x148   : > { %895 = vst [vmem:[%s298_s24] sm:$0x1] %v894_v18  ;;  %v964_v26 = vadd.f32 %v963_v37, %v962_v36 }
 0x14a   : > { %965 = vst [vmem:[%s304_s27] sm:$0x1] %v964_v26 }
 0x14b PF: > { %s15_s17 = sadd.s32 1, %s1329_s17   ;;  %s1563_s15 = smov %s1325_s16 }
 0x14c   : > { %p12_p6 = scmp.ge.s32.totalorder %s15_s17, 4   ;;  %s1564_s16 = smov %s1566_s18 }
 0x14e   :  { %14 = sbr.rel (!%p12_p6) target bundleno = 2 (0x2), region = 93 }

// kernel: double_conv_forward.6
= control target key start
LH: loop header
LB: loop body
LE: loop exit
PB: predicated region body
PF: predicated region fallthrough
CT: control target
= control target key end

     0   :  { %s1593_s15 = smov 0   ;;  %s1595_s16 = smov 0   ;;  %s1995_s0 = inlined_call_operand.vmem [shape: bf16[512,384], index: 0, kind: input, shape index: {}]   ;;  %s1996_s1 = inlined_call_operand.vmem [shape: bf16[384,128], index: 1, kind: input, shape index: {}]   ;;  %s1997_s2 = inlined_call_operand.vmem [shape: f32[512,128], index: 2, kind: output, shape index: {0}]   ;;  %s1998_s3 = inlined_call_operand.vmem [shape: f32[2,1,128], index: 3, kind: output, shape index: {1}]   ;;  %s1999_s4 = inlined_call_operand.vmem [shape: f32[2,1,128], index: 4, kind: output, shape index: {2}]  }
   0x1   :  { %s1597_s17 = smov 0   ;;  %s1599_s18 = smov 0  }
   0x2   :  { %s1601_s19 = smov 0   ;;  %s1603_s20 = smov 0  }
   0x3   :  { %s1605_s21 = smov 0  }
   0x4 LB: > { %s27_s22 = sadd.s32 1, %s1557_s19  ;;  %s34_s23 = sadd.s32 1, %s1561_s20  ;;  %s1565_s21 = sphi %s1605_s21, %s15_s21   ;;  %s1561_s20 = sphi %s1603_s20, %s2005_s20   ;;  %s1557_s19 = sphi %s1601_s19, %s2004_s19   ;;  %s1553_s18 = sphi %s1599_s18, %s2003_s18   ;;  %s1549_s17 = sphi %s1597_s17, %s2002_s17   ;;  %s1545_s16 = sphi %s1595_s16, %s2001_s16   ;;  %s1541_s15 = sphi %s1593_s15, %s2000_s15  }
   0x5   : > { %p28_p0 = scmp.ge.s32.totalorder %s27_s22, 3  ;;  %p50_p1 = scmp.ne.s32.totalorder %s1545_s16, %s1541_s15 }
   0x6   : > { %p51_p2 = scmp.eq.s32.totalorder %s1565_s21, 0  ;;  %s43_s27 = sadd.s32 1, %s1545_s16 }
   0x7   : > { %s2007_s22 = smov (%p28_p0, %s27_s22), 0  ;;  %s2009_s23 = smov (!%p28_p0, %s34_s23), %s1561_s20 }
   0x8   : > { %p52_p3 = por %p51_p2, %p50_p1  ;;  %p36_p4 = scmp.ge.s32.totalorder %s2009_s23, 2 }
   0x9   : > { %s39_s24 = ssub.s32 %s1557_s19, %s2007_s22  ;;  %p1302_p6 = scmp.ge.s32.totalorder %s1565_s21, 6 }
   0xa   : > { %s2011_s23 = smov (%p36_p4, %s2009_s23), 0 }
   0xb   : > { %s38_s25 = ssub.s32 %s1561_s20, %s2011_s23  ;;  %188 = sbr.rel (%p1302_p6) target bundleno = 46 (0x2e), region = 16 }
   0xc   : > { %s40_s26 = sor.u32 %s39_s24, %s38_s25 }
   0xd   : > { %p41_p5 = scmp.eq.s32.totalorder %s40_s26, 0 }
   0xf   : > { %s1644_s28 = scalar_select %p41_p5, %s1545_s16, %s43_s27  }
  0x12   : > { %191 = sbr.rel (!%p52_p3) target bundleno = 46 (0x2e), region = 20  ;;  %s193_s29 = sand.u32 (%p52_p3), 1, %s1545_s16  }
  0x13   : > { %s1429_s30 = smul.u32 (%p52_p3), 96, %s1561_s20  ;;  %s1303_s5 = sshll.u32 (%p52_p3), %s193_s29, 7 }
  0x14   : > { %s1658_s11 = scalar_lea.vmem (%p52_p3), [#allocation3], %s1303_s5 }
  0x15   : > { %s198_s6 = sadd.s32 (%p52_p3), %s1557_s19, %s1429_s30 }
  0x16   : > { %s1306_s7 = sshll.u32 (%p52_p3), %s198_s6, 2 }
  0x17   : > { %s1653_s10 = scalar_lea.vmem (%p52_p3), %s1995_s0, %s1306_s7 }
  0x18   : > { %v216_v0 = vld [vmem:[%s1653_s10] sm:$0xf] (%p52_p3)  ;;  %v218_v1 = vld [vmem:[%s1653_s10 + $0xc] sm:$0xf] (%p52_p3)  ;;  %v220_v2 = vld [vmem:[%s1653_s10 + $0x18] sm:$0xf] (%p52_p3) }
  0x19   : > { %217 = vst [vmem:[%s1658_s11] sm:$0xf] %v216_v0  ;;  %219 = vst [vmem:[%s1658_s11 + $0x4] sm:$0xf] %v218_v1  ;;  %v222_v3 = vld [vmem:[%s1653_s10 + $0x24] sm:$0xf] }
  0x1a   : > { %221 = vst [vmem:[%s1658_s11 + $0x8] sm:$0xf] %v220_v2  ;;  %v224_v4 = vld [vmem:[%s1653_s10 + $0x30] sm:$0xf]  ;;  %v226_v5 = vld [vmem:[%s1653_s10 + $0x3c] sm:$0xf] }
  0x1b   : > { %223 = vst [vmem:[%s1658_s11 + $0xc] sm:$0xf] %v222_v3  ;;  %225 = vst [vmem:[%s1658_s11 + $0x10] sm:$0xf] %v224_v4  ;;  %v228_v6 = vld [vmem:[%s1653_s10 + $0x48] sm:$0xf] }
  0x1c   : > { %227 = vst [vmem:[%s1658_s11 + $0x14] sm:$0xf] %v226_v5  ;;  %v230_v7 = vld [vmem:[%s1653_s10 + $0x54] sm:$0xf]  ;;  %v232_v8 = vld [vmem:[%s1653_s10 + $0x60] sm:$0xf] }
  0x1d   : > { %229 = vst [vmem:[%s1658_s11 + $0x18] sm:$0xf] %v228_v6  ;;  %231 = vst [vmem:[%s1658_s11 + $0x1c] sm:$0xf] %v230_v7  ;;  %v234_v9 = vld [vmem:[%s1653_s10 + $0x6c] sm:$0xf] }
  0x1e   : > { %233 = vst [vmem:[%s1658_s11 + $0x20] sm:$0xf] %v232_v8  ;;  %v236_v10 = vld [vmem:[%s1653_s10 + $0x78] sm:$0xf]  ;;  %v238_v11 = vld [vmem:[%s1653_s10 + $0x84] sm:$0xf] }
  0x1f   : > { %235 = vst [vmem:[%s1658_s11 + $0x24] sm:$0xf] %v234_v9  ;;  %237 = vst [vmem:[%s1658_s11 + $0x28] sm:$0xf] %v236_v10  ;;  %v240_v12 = vld [vmem:[%s1653_s10 + $0x90] sm:$0xf] }
  0x20   : > { %239 = vst [vmem:[%s1658_s11 + $0x2c] sm:$0xf] %v238_v11  ;;  %v242_v13 = vld [vmem:[%s1653_s10 + $0x9c] sm:$0xf]  ;;  %v244_v14 = vld [vmem:[%s1653_s10 + $0xa8] sm:$0xf] }
  0x21   : > { %241 = vst [vmem:[%s1658_s11 + $0x30] sm:$0xf] %v240_v12  ;;  %243 = vst [vmem:[%s1658_s11 + $0x34] sm:$0xf] %v242_v13  ;;  %v246_v15 = vld [vmem:[%s1653_s10 + $0xb4] sm:$0xf] }
  0x22   : > { %245 = vst [vmem:[%s1658_s11 + $0x38] sm:$0xf] %v244_v14  ;;  %v248_v16 = vld [vmem:[%s1653_s10 + $0xc0] sm:$0xf]  ;;  %v250_v17 = vld [vmem:[%s1653_s10 + $0xcc] sm:$0xf] }
  0x23   : > { %247 = vst [vmem:[%s1658_s11 + $0x3c] sm:$0xf] %v246_v15  ;;  %249 = vst [vmem:[%s1658_s11 + $0x40] sm:$0xf] %v248_v16  ;;  %v252_v18 = vld [vmem:[%s1653_s10 + $0xd8] sm:$0xf] }
  0x24   : > { %251 = vst [vmem:[%s1658_s11 + $0x44] sm:$0xf] %v250_v17  ;;  %v254_v19 = vld [vmem:[%s1653_s10 + $0xe4] sm:$0xf]  ;;  %v256_v20 = vld [vmem:[%s1653_s10 + $0xf0] sm:$0xf] }
  0x25   : > { %253 = vst [vmem:[%s1658_s11 + $0x48] sm:$0xf] %v252_v18  ;;  %255 = vst [vmem:[%s1658_s11 + $0x4c] sm:$0xf] %v254_v19  ;;  %v258_v21 = vld [vmem:[%s1653_s10 + $0xfc] sm:$0xf] }
  0x26   : > { %257 = vst [vmem:[%s1658_s11 + $0x50] sm:$0xf] %v256_v20  ;;  %v260_v22 = vld [vmem:[%s1653_s10 + $0x108] sm:$0xf]  ;;  %v262_v23 = vld [vmem:[%s1653_s10 + $0x114] sm:$0xf] }
  0x27   : > { %259 = vst [vmem:[%s1658_s11 + $0x54] sm:$0xf] %v258_v21  ;;  %261 = vst [vmem:[%s1658_s11 + $0x58] sm:$0xf] %v260_v22  ;;  %v264_v24 = vld [vmem:[%s1653_s10 + $0x120] sm:$0xf] }
  0x28   : > { %263 = vst [vmem:[%s1658_s11 + $0x5c] sm:$0xf] %v262_v23  ;;  %v266_v25 = vld [vmem:[%s1653_s10 + $0x12c] sm:$0xf]  ;;  %v268_v26 = vld [vmem:[%s1653_s10 + $0x138] sm:$0xf] }
  0x29   : > { %265 = vst [vmem:[%s1658_s11 + $0x60] sm:$0xf] %v264_v24  ;;  %267 = vst [vmem:[%s1658_s11 + $0x64] sm:$0xf] %v266_v25  ;;  %v270_v27 = vld [vmem:[%s1653_s10 + $0x144] sm:$0xf] }
  0x2a   : > { %269 = vst [vmem:[%s1658_s11 + $0x68] sm:$0xf] %v268_v26  ;;  %v272_v28 = vld [vmem:[%s1653_s10 + $0x150] sm:$0xf]  ;;  %v274_v29 = vld [vmem:[%s1653_s10 + $0x15c] sm:$0xf] }
  0x2b   : > { %271 = vst [vmem:[%s1658_s11 + $0x6c] sm:$0xf] %v270_v27  ;;  %273 = vst [vmem:[%s1658_s11 + $0x70] sm:$0xf] %v272_v28  ;;  %v276_v30 = vld [vmem:[%s1653_s10 + $0x168] sm:$0xf] }
  0x2c   : > { %275 = vst [vmem:[%s1658_s11 + $0x74] sm:$0xf] %v274_v29  ;;  %v278_v31 = vld [vmem:[%s1653_s10 + $0x174] sm:$0xf]  ;;  %277 = vst [vmem:[%s1658_s11 + $0x78] sm:$0xf] %v276_v30 }
  0x2d   : > { %279 = vst [vmem:[%s1658_s11 + $0x7c] sm:$0xf] %v278_v31 }
  0x2e PF: > { %p1307_p7 = scmp.ge.s32.totalorder %s1565_s21, 1  ;;  %p377_p8 = scmp.lt.s32.totalorder %s1565_s21, 7 }
  0x30   : > { %p378_p9 = pnand %p1307_p7, %p377_p8 }
  0x31   : > { %s384_s12 = sand.u32 (!%p378_p9), 1, %s1541_s15   ;;  %s1309_s13 = sshll.u32 (!%p378_p9), %s1549_s17, 4 }
  0x32   : > { %381 = sbr.rel (%p378_p9) target bundleno = 414 (0x19e), region = 65  ;;  %s1308_s14 = sshll.u32 (!%p378_p9), %s384_s12, 7 }
  0x33   : > { %p434_p10 = scmp.lt.s32.totalorder (!%p378_p9), %s1309_s13, 47  ;;  %s1311_s24 = sshll.u32 (!%p378_p9), %s1553_s18, 5 }
  0x34   : > { %p443_p11 = scmp.lt.s32.totalorder (!%p378_p9), %s1311_s24, 63  ;;  %p451_p12 = scmp.lt.s32.totalorder (!%p378_p9), %s1553_s18, 1 }
  0x35   : > { %p1313_p13 = scmp.ne.s32.totalorder (!%p378_p9), %s1549_s17, 0 }
  0x39   : > { %s2013_s13 = smov (!%p434_p10, %s1309_s13), 47  ;;  %s2015_s24 = smov (!%p443_p11, %s1311_s24), 63 }
  0x3a   : > { %s1310_s25 = sshll.u32 %s2013_s13, 2  ;;  %s2017_s18 = smov (!%p451_p12, %s1553_s18), 1  ;;  %v1567_v32 = vmov (!%p1313_p13), 0.0  }
  0x3b   : > { %s1730_s29 = scalar_lea.vmem %s1996_s1, %s1310_s25  ;;  %s1312_s30 = sshll.u32 %s2015_s24, 3  ;;  %468 = vst [vmem:[#allocation2] sm:$0xff] (!%p1313_p13), %v1567_v32  ;;  %469 = vst [vmem:[#allocation2 + $0x8] sm:$0xff] (!%p1313_p13), %v1567_v32 }
  0x3c   : > { %s1738_s6 = scalar_lea.vmem %s1997_s2, %s1312_s30  ;;  %s456_s9 = scalar_lea.vmem %s1998_s3, %s2017_s18  ;;  %470 = vst [vmem:[#allocation2 + $0x10] sm:$0xff] (!%p1313_p13), %v1567_v32  ;;  %471 = vst [vmem:[#allocation2 + $0x18] sm:$0xff] (!%p1313_p13), %v1567_v32 }
  0x3d   : > { %s462_s12 = scalar_lea.vmem %s1999_s4, %s2017_s18  ;;  %s1748_s13 = scalar_lea.vmem [#allocation3], %s1308_s14  ;;  %472 = vst [vmem:[#allocation2 + $0x20] sm:$0xff] (!%p1313_p13), %v1567_v32  ;;  %473 = vst [vmem:[#allocation2 + $0x28] sm:$0xff] (!%p1313_p13), %v1567_v32 }
  0x3e   : > { %467 = sbr.rel (%p1313_p13) target bundleno = 75 (0x4b), region = 73  ;;  %474 = vst [vmem:[#allocation2 + $0x30] sm:$0xff] (!%p1313_p13), %v1567_v32  ;;  %475 = vst [vmem:[#allocation2 + $0x38] sm:$0xff] (!%p1313_p13), %v1567_v32 }
  0x3f   : > { %476 = vst [vmem:[#allocation2 + $0x40] sm:$0xff] (!%p1313_p13), %v1567_v32  ;;  %477 = vst [vmem:[#allocation2 + $0x48] sm:$0xff] (!%p1313_p13), %v1567_v32 }
  0x40   : > { %478 = vst [vmem:[#allocation2 + $0x50] sm:$0xff] (!%p1313_p13), %v1567_v32  ;;  %479 = vst [vmem:[#allocation2 + $0x58] sm:$0xff] (!%p1313_p13), %v1567_v32 }
  0x41   : > { %480 = vst [vmem:[#allocation2 + $0x60] sm:$0xff] (!%p1313_p13), %v1567_v32  ;;  %481 = vst [vmem:[#allocation2 + $0x68] sm:$0xff] (!%p1313_p13), %v1567_v32 }
  0x42   : > { %482 = vst [vmem:[#allocation2 + $0x70] sm:$0xff] (!%p1313_p13), %v1567_v32  ;;  %483 = vst [vmem:[#allocation2 + $0x78] sm:$0xff] (!%p1313_p13), %v1567_v32 }
  0x43   : > { %484 = vst [vmem:[#allocation2 + $0x80] sm:$0xff] (!%p1313_p13), %v1567_v32  ;;  %485 = vst [vmem:[#allocation2 + $0x88] sm:$0xff] (!%p1313_p13), %v1567_v32 }
  0x44   : > { %486 = vst [vmem:[#allocation2 + $0x90] sm:$0xff] (!%p1313_p13), %v1567_v32  ;;  %487 = vst [vmem:[#allocation2 + $0x98] sm:$0xff] (!%p1313_p13), %v1567_v32 }
  0x45   : > { %488 = vst [vmem:[#allocation2 + $0xa0] sm:$0xff] %v1567_v32  ;;  %489 = vst [vmem:[#allocation2 + $0xa8] sm:$0xff] %v1567_v32 }
  0x46   : > { %490 = vst [vmem:[#allocation2 + $0xb0] sm:$0xff] %v1567_v32  ;;  %491 = vst [vmem:[#allocation2 + $0xb8] sm:$0xff] %v1567_v32 }
  0x47   : > { %492 = vst [vmem:[#allocation2 + $0xc0] sm:$0xff] %v1567_v32  ;;  %493 = vst [vmem:[#allocation2 + $0xc8] sm:$0xff] %v1567_v32 }
  0x48   : > { %494 = vst [vmem:[#allocation2 + $0xd0] sm:$0xff] %v1567_v32  ;;  %495 = vst [vmem:[#allocation2 + $0xd8] sm:$0xff] %v1567_v32 }
  0x49   : > { %496 = vst [vmem:[#allocation2 + $0xe0] sm:$0xff] %v1567_v32  ;;  %497 = vst [vmem:[#allocation2 + $0xe8] sm:$0xff] %v1567_v32 }
  0x4a   : > { %498 = vst [vmem:[#allocation2 + $0xf0] sm:$0xff] %v1567_v32  ;;  %499 = vst [vmem:[#allocation2 + $0xf8] sm:$0xff] %v1567_v32 }
  0x4b PF: > { %v1487_v33 = vld [vmem:[%s1730_s29] sm:$0xff]   ;;  %v1488_v34 = vld [vmem:[%s1730_s29 + $0x8] sm:$0xff]   ;;  %v1489_v35 = vld [vmem:[%s1730_s29 + $0x10] sm:$0xff]   ;;  %p1338_p0 = scmp.ne.s32.totalorder %s1549_s17, 2 }
  0x4c   : > { %1365 = vmatprep.subr.bf16.mxu0 %v1487_v33  ;;  %1413 = vmatprep.subr.bf16.mxu1 %v1487_v33  ;;  %v1490_v36 = vld [vmem:[%s1730_s29 + $0x18] sm:$0xff]   ;;  %v1495_v37 = vld [vmem:[%s1748_s13] sm:$0xff]   ;;  %v1492_v40 = vld [vmem:[%s1730_s29 + $0x28] sm:$0xff]  }
  0x4d   : > { %1366 = vmatpush3.bf16.msra.mxu0 %v1487_v33  ;;  %1421 = vmatpush3.bf16.msra.mxu1 %v1487_v33  ;;  %v1496_v38 = vld [vmem:[%s1748_s13 + $0x40] sm:$0xff]   ;;  %v1493_v41 = vld [vmem:[%s1730_s29 + $0x30] sm:$0xff]   ;;  %v1494_v42 = vld [vmem:[%s1730_s29 + $0x38] sm:$0xff]  }
  0x4e   : > { %1367 = vmatprep.subr.bf16.mxu0 %v1488_v34  ;;  %1414 = vmatprep.subr.bf16.mxu1 %v1488_v34  ;;  %v1491_v39 = vld [vmem:[%s1730_s29 + $0x20] sm:$0xff]   ;;  %v1497_v43 = vld [vmem:[%s1748_s13 + $0x8] sm:$0xff]   ;;  %v1499_v45 = vld [vmem:[%s1748_s13 + $0x10] sm:$0xff]  }
  0x4f   : > { %1381 = vmatprep.mubr.bf16.mxu0 %v1495_v37  ;;  %1397 = vmatprep.mubr.bf16.mxu1 %v1496_v38  ;;  %v1498_v44 = vld [vmem:[%s1748_s13 + $0x48] sm:$0xff]   ;;  %v1500_v46 = vld [vmem:[%s1748_s13 + $0x50] sm:$0xff]   ;;  %v1501_v47 = vld [vmem:[%s1748_s13 + $0x18] sm:$0xff]  }
  0x50   : > { %v1502_v48 = vld [vmem:[%s1748_s13 + $0x58] sm:$0xff]   ;;  %v1503_v49 = vld [vmem:[%s1748_s13 + $0x20] sm:$0xff]   ;;  %v1505_v51 = vld [vmem:[%s1748_s13 + $0x28] sm:$0xff]  }
  0x51   : > { %1368 = vmatpush3.bf16.msra.mxu0 %v1488_v34  ;;  %1422 = vmatpush3.bf16.msra.mxu1 %v1488_v34  ;;  %v1504_v50 = vld [vmem:[%s1748_s13 + $0x60] sm:$0xff]   ;;  %v1506_v52 = vld [vmem:[%s1748_s13 + $0x68] sm:$0xff]   ;;  %v1507_v53 = vld [vmem:[%s1748_s13 + $0x30] sm:$0xff]  }
  0x52   : > { %1369 = vmatprep.subr.bf16.mxu0 %v1489_v35  ;;  %1415 = vmatprep.subr.bf16.mxu1 %v1489_v35  ;;  %v1508_v54 = vld [vmem:[%s1748_s13 + $0x70] sm:$0xff]   ;;  %v1509_v55 = vld [vmem:[%s1748_s13 + $0x38] sm:$0xff]   ;;  %v500_v59 = vld [vmem:[#allocation2] sm:$0xff] }
  0x53   : > { %v1510_v56 = vld [vmem:[%s1748_s13 + $0x78] sm:$0xff]   ;;  %v502_v57 = vld [vmem:[#allocation2 + $0x10] sm:$0xff]  ;;  %v516_v60 = vld [vmem:[#allocation2 + $0x80] sm:$0xff] }
  0x54   : > { %v518_v58 = vld [vmem:[#allocation2 + $0x90] sm:$0xff]  ;;  %v503_v63 = vld [vmem:[#allocation2 + $0x18] sm:$0xff]  ;;  %v501_v5 = vld [vmem:[#allocation2 + $0x8] sm:$0xff] }
  0x55   : > { %1370 = vmatpush3.bf16.msra.mxu0 %v1489_v35  ;;  %1423 = vmatpush3.bf16.msra.mxu1 %v1489_v35  ;;  %v519_v0 = vld [vmem:[#allocation2 + $0x98] sm:$0xff]  ;;  %v517_v6 = vld [vmem:[#allocation2 + $0x88] sm:$0xff]  ;;  %v506_v17 = vld [vmem:[#allocation2 + $0x30] sm:$0xff] }
  0x56   : > { %1371 = vmatprep.subr.bf16.mxu0 %v1490_v36  ;;  %1416 = vmatprep.subr.bf16.mxu1 %v1490_v36  ;;  %v522_v18 = vld [vmem:[#allocation2 + $0xb0] sm:$0xff]  ;;  %v504_v19 = vld [vmem:[#allocation2 + $0x20] sm:$0xff]  ;;  %v507_v23 = vld [vmem:[#allocation2 + $0x38] sm:$0xff] }
  0x57   : > { %v520_v20 = vld [vmem:[#allocation2 + $0xa0] sm:$0xff]  ;;  %v523_v24 = vld [vmem:[#allocation2 + $0xb8] sm:$0xff]  ;;  %v505_v29 = vld [vmem:[#allocation2 + $0x28] sm:$0xff] }
  0x58   : > { %v521_v30 = vld [vmem:[#allocation2 + $0xa8] sm:$0xff] }
  0x59   : > { %1372 = vmatpush3.bf16.msra.mxu0 %v1490_v36  ;;  %1424 = vmatpush3.bf16.msra.mxu1 %v1490_v36 }
  0x5a   : > { %1373 = vmatprep.subr.bf16.mxu0 %v1491_v39  ;;  %1417 = vmatprep.subr.bf16.mxu1 %v1491_v39 }
  0x5d   : > { %1374 = vmatpush3.bf16.msra.mxu0 %v1491_v39  ;;  %1425 = vmatpush3.bf16.msra.mxu1 %v1491_v39 }
  0x5e   : > { %1375 = vmatprep.subr.bf16.mxu0 %v1492_v40  ;;  %1418 = vmatprep.subr.bf16.mxu1 %v1492_v40 }
  0x61   : > { %1376 = vmatpush3.bf16.msra.mxu0 %v1492_v40  ;;  %1426 = vmatpush3.bf16.msra.mxu1 %v1492_v40 }
  0x62   : > { %1377 = vmatprep.subr.bf16.mxu0 %v1493_v41  ;;  %1419 = vmatprep.subr.bf16.mxu1 %v1493_v41 }
  0x65   : > { %1378 = vmatpush3.bf16.msra.mxu0 %v1493_v41  ;;  %1427 = vmatpush3.bf16.msra.mxu1 %v1493_v41  ;;  %v510_v41 = vld [vmem:[#allocation2 + $0x50] sm:$0xff] }
  0x66   : > { %1379 = vmatprep.subr.bf16.mxu0 %v1494_v42  ;;  %1420 = vmatprep.subr.bf16.mxu1 %v1494_v42 }
  0x69   : > { %1380 = vmatpush3.bf16.msra.mxu0 %v1494_v42  ;;  %1428 = vmatpush3.bf16.msra.mxu1 %v1494_v42  ;;  %v526_v42 = vld [vmem:[#allocation2 + $0xd0] sm:$0xff] }
  0x6c   : > { %1382 = vmatmul.mubr.bf16.vlgmr.msra.gmra.mrb[0].mxu0 %v1497_v43  ;;  %1398 = vmatmul.mubr.bf16.vlgmr.msra.gmra.mrb[0].mxu1 %v1498_v44  ;;  %v508_v43 = vld [vmem:[#allocation2 + $0x40] sm:$0xff] }
  0x6d   : > { %1385 = vmatprep.mubr.bf16.mxu0 %v1499_v45  ;;  %1401 = vmatprep.mubr.bf16.mxu1 %v1500_v46  ;;  %v524_v44 = vld [vmem:[#allocation2 + $0xc0] sm:$0xff] }
  0x74   : > { %1386 = vmatmul.mubr.bf16.gmra.mrb[4].mxu0 %v1501_v47  ;;  %1402 = vmatmul.mubr.bf16.gmra.mrb[4].mxu1 %v1502_v48  ;;  %v511_v47 = vld [vmem:[#allocation2 + $0x58] sm:$0xff] }
  0x75   : > { %1389 = vmatprep.mubr.bf16.mxu0 %v1503_v49  ;;  %1405 = vmatprep.mubr.bf16.mxu1 %v1504_v50  ;;  %v527_v48 = vld [vmem:[#allocation2 + $0xd8] sm:$0xff] }
  0x7c   : > { %1390 = vmatmul.mubr.bf16.gmra.mrb[8].mxu0 %v1505_v51  ;;  %1406 = vmatmul.mubr.bf16.gmra.mrb[8].mxu1 %v1506_v52 }
  0x7d   : > { %1393 = vmatprep.mubr.bf16.mxu0 %v1507_v53  ;;  %1409 = vmatprep.mubr.bf16.mxu1 %v1508_v54  ;;  %v509_v53 = vld [vmem:[#allocation2 + $0x48] sm:$0xff] }
  0x7e   : > { %v525_v54 = vld [vmem:[#allocation2 + $0xc8] sm:$0xff] }
  0x84   : > { %1394 = vmatmul.mubr.bf16.gmra.mrb[12].mxu0 %v1509_v55  ;;  %1410 = vmatmul.mubr.bf16.gmra.mrb[12].mxu1 %v1510_v56 }
 0x13f   : > { %v1383_v61 = vpop.f32.mrb[0].mxu0  ;;  %v1399_v62 = vpop.f32.mrb[0].mxu1 }
 0x140   : > { %v887_v1 = vadd.f32 %v1383_v61, %v502_v57  ;;  %v903_v2 = vadd.f32 %v1399_v62, %v518_v58  ;;  %v758_v3 = vpop.f32.mrb[1].mxu0  ;;  %v822_v4 = vpop.f32.mrb[1].mxu1 }
 0x141   : > { %v885_v7 = vadd.f32 %v758_v3, %v500_v59  ;;  %v901_v8 = vadd.f32 %v822_v4, %v516_v60  ;;  %v1384_v9 = vpop.f32.mrb[2].mxu0  ;;  %v1400_v10 = vpop.f32.mrb[2].mxu1  ;;  %v512_v3 = vld [vmem:[#allocation2 + $0x60] sm:$0xff] }
 0x142   : > { %919 = vst [vmem:[#allocation2 + $0x10] sm:$0xff] %v887_v1  ;;  %935 = vst [vmem:[#allocation2 + $0x90] sm:$0xff] %v903_v2  ;;  %v888_v11 = vadd.f32 %v1384_v9, %v503_v63  ;;  %v904_v12 = vadd.f32 %v1400_v10, %v519_v0  ;;  %v761_v13 = vpop.f32.mrb[3].mxu0  ;;  %v825_v14 = vpop.f32.mrb[3].mxu1  ;;  %v514_v1 = vld [vmem:[#allocation2 + $0x70] sm:$0xff]  ;;  %v528_v4 = vld [vmem:[#allocation2 + $0xe0] sm:$0xff] }
 0x143   : > { %917 = vst [vmem:[#allocation2] sm:$0xff] %v885_v7  ;;  %933 = vst [vmem:[#allocation2 + $0x80] sm:$0xff] %v901_v8  ;;  %v886_v15 = vadd.f32 %v761_v13, %v501_v5  ;;  %v902_v16 = vadd.f32 %v825_v14, %v517_v6  ;;  %v530_v2 = vld [vmem:[#allocation2 + $0xf0] sm:$0xff]  ;;  %v515_v7 = vld [vmem:[#allocation2 + $0x78] sm:$0xff] }
 0x144   : > { %920 = vst [vmem:[#allocation2 + $0x18] sm:$0xff] %v888_v11  ;;  %936 = vst [vmem:[#allocation2 + $0x98] sm:$0xff] %v904_v12  ;;  %v531_v8 = vld [vmem:[#allocation2 + $0xf8] sm:$0xff]  ;;  %v513_v13 = vld [vmem:[#allocation2 + $0x68] sm:$0xff] }
 0x145   : > { %918 = vst [vmem:[#allocation2 + $0x8] sm:$0xff] %v886_v15  ;;  %934 = vst [vmem:[#allocation2 + $0x88] sm:$0xff] %v902_v16  ;;  %v529_v14 = vld [vmem:[#allocation2 + $0xe8] sm:$0xff] }
 0x147   : > { %v1387_v21 = vpop.f32.mrb[4].mxu0  ;;  %v1403_v22 = vpop.f32.mrb[4].mxu1 }
 0x148   : > { %v891_v25 = vadd.f32 %v1387_v21, %v506_v17  ;;  %v907_v26 = vadd.f32 %v1403_v22, %v522_v18  ;;  %v774_v27 = vpop.f32.mrb[5].mxu0  ;;  %v838_v28 = vpop.f32.mrb[5].mxu1 }
 0x149   : > { %v889_v31 = vadd.f32 %v774_v27, %v504_v19  ;;  %v905_v32 = vadd.f32 %v838_v28, %v520_v20  ;;  %v1388_v33 = vpop.f32.mrb[6].mxu0  ;;  %v1404_v34 = vpop.f32.mrb[6].mxu1  ;;  %v955_v27 = vld [vmem:[#allocation2 + $0x10] sm:$0xff] (!%p1338_p0) }
 0x14a   : > { %923 = vst [vmem:[#allocation2 + $0x30] sm:$0xff] %v891_v25  ;;  %939 = vst [vmem:[#allocation2 + $0xb0] sm:$0xff] %v907_v26  ;;  %v892_v35 = vadd.f32 %v1388_v33, %v507_v23  ;;  %v908_v36 = vadd.f32 %v1404_v34, %v523_v24  ;;  %v777_v37 = vpop.f32.mrb[7].mxu0  ;;  %v841_v38 = vpop.f32.mrb[7].mxu1  ;;  %v953_v25 = vld [vmem:[#allocation2] sm:$0xff] (!%p1338_p0) }
 0x14b   : > { %921 = vst [vmem:[#allocation2 + $0x20] sm:$0xff] %v889_v31  ;;  %937 = vst [vmem:[#allocation2 + $0xa0] sm:$0xff] %v905_v32  ;;  %v890_v39 = vadd.f32 %v777_v37, %v505_v29  ;;  %v906_v40 = vadd.f32 %v841_v38, %v521_v30  ;;  %v1055_v28 = vmul.f32 (!%p1338_p0), %v953_v25, %v953_v25  ;;  %v956_v32 = vld [vmem:[#allocation2 + $0x18] sm:$0xff] (!%p1338_p0) }
 0x14c   : > { %924 = vst [vmem:[#allocation2 + $0x38] sm:$0xff] %v892_v35  ;;  %940 = vst [vmem:[#allocation2 + $0xb8] sm:$0xff] %v908_v36  ;;  %v954_v26 = vld [vmem:[#allocation2 + $0x8] sm:$0xff] (!%p1338_p0)  ;;  %v1057_v31 = vmul.f32 (!%p1338_p0), %v955_v27, %v955_v27 }
 0x14d   : > { %922 = vst [vmem:[#allocation2 + $0x28] sm:$0xff] %v890_v39  ;;  %938 = vst [vmem:[#allocation2 + $0xa8] sm:$0xff] %v906_v40  ;;  %v1017_v29 = vadd.f32 (!%p1338_p0), %v954_v26, %v953_v25  ;;  %v1056_v30 = vmul.f32 (!%p1338_p0), %v954_v26, %v954_v26  ;;  %v1058_v40 = vmul.f32 (!%p1338_p0), %v956_v32, %v956_v32 }
 0x14e   : > { %985 = vst [vmem:[%s1738_s6] sm:$0xff] (!%p1338_p0), %v953_v25  ;;  %986 = vst [vmem:[%s1738_s6 + $0x8] sm:$0xff] (!%p1338_p0), %v954_v26 }
 0x14f   : > { %v1391_v45 = vpop.f32.mrb[8].mxu0  ;;  %v1407_v46 = vpop.f32.mrb[8].mxu1  ;;  %987 = vst [vmem:[%s1738_s6 + $0x10] sm:$0xff] (!%p1338_p0), %v955_v27  ;;  %988 = vst [vmem:[%s1738_s6 + $0x18] sm:$0xff] (!%p1338_p0), %v956_v32  ;;  %v1087_v38 = vadd.f32 (!%p1338_p0), %v1056_v30, %v1055_v28  ;;  %v1018_v39 = vadd.f32 (!%p1338_p0), %v1017_v29, %v955_v27 }
 0x150   : > { %v895_v49 = vadd.f32 %v1391_v45, %v510_v41  ;;  %v911_v50 = vadd.f32 %v1407_v46, %v526_v42  ;;  %v790_v51 = vpop.f32.mrb[9].mxu0  ;;  %v854_v52 = vpop.f32.mrb[9].mxu1 }
 0x151   : > { %v893_v55 = vadd.f32 %v790_v51, %v508_v43  ;;  %v909_v56 = vadd.f32 %v854_v52, %v524_v44  ;;  %v1392_v57 = vpop.f32.mrb[10].mxu0  ;;  %v1408_v58 = vpop.f32.mrb[10].mxu1  ;;  %v1782_v35 = vld [vmem:[#allocation2 + $0x30] sm:$0xff] (!%p1338_p0)  ;;  %v1820_v51 = vld [vmem:[#allocation2 + $0x80] sm:$0xff] (!%p1338_p0)  ;;  %v1822_v52 = vld [vmem:[#allocation2 + $0x88] sm:$0xff] (!%p1338_p0) }
 0x152   : > { %927 = vst [vmem:[#allocation2 + $0x50] sm:$0xff] %v895_v49  ;;  %943 = vst [vmem:[#allocation2 + $0xd0] sm:$0xff] %v911_v50  ;;  %v896_v59 = vadd.f32 %v1392_v57, %v511_v47  ;;  %v912_v60 = vadd.f32 %v1408_v58, %v527_v48  ;;  %v793_v61 = vpop.f32.mrb[11].mxu0  ;;  %v857_v62 = vpop.f32.mrb[11].mxu1  ;;  %v957_v33 = vld [vmem:[#allocation2 + $0x20] sm:$0xff] (!%p1338_p0)  ;;  %v1088_v47 = vadd.f32 (!%p1338_p0), %v1087_v38, %v1057_v31 }
 0x153   : > { %925 = vst [vmem:[#allocation2 + $0x40] sm:$0xff] %v893_v55  ;;  %941 = vst [vmem:[#allocation2 + $0xc0] sm:$0xff] %v909_v56  ;;  %v894_v63 = vadd.f32 %v793_v61, %v509_v53  ;;  %v910_v0 = vadd.f32 %v857_v62, %v525_v54  ;;  %v1784_v36 = vld [vmem:[#allocation2 + $0x38] sm:$0xff] (!%p1338_p0)  ;;  %v1019_v48 = vadd.f32 (!%p1338_p0), %v1018_v39, %v956_v32  ;;  %v1830_v53 = vld [vmem:[#allocation2 + $0x90] sm:$0xff] (!%p1338_p0) }
 0x154   : > { %928 = vst [vmem:[#allocation2 + $0x58] sm:$0xff] %v896_v59  ;;  %944 = vst [vmem:[#allocation2 + $0xd8] sm:$0xff] %v912_v60  ;;  %v958_v34 = vld [vmem:[#allocation2 + $0x28] sm:$0xff] (!%p1338_p0)  ;;  %v1059_v49 = vmul.f32 (!%p1338_p0), %v957_v33, %v957_v33  ;;  %v1832_v54 = vld [vmem:[#allocation2 + $0x98] sm:$0xff] (!%p1338_p0)  ;;  %v1089_v56 = vadd.f32 (!%p1338_p0), %v1088_v47, %v1058_v40  ;;  %v1071_v38 = vmul.f32 (!%p1338_p0), %v1820_v51, %v1820_v51 }
 0x155   : > { %926 = vst [vmem:[#allocation2 + $0x48] sm:$0xff] %v894_v63  ;;  %942 = vst [vmem:[#allocation2 + $0xc8] sm:$0xff] %v910_v0  ;;  %v1834_v55 = vld [vmem:[#allocation2 + $0xa0] sm:$0xff] (!%p1338_p0)  ;;  %v1020_v57 = vadd.f32 (!%p1338_p0), %v1019_v48, %v957_v33  ;;  %v1060_v58 = vmul.f32 (!%p1338_p0), %v958_v34, %v958_v34  ;;  %v1842_v59 = vld [vmem:[#allocation2 + $0xa8] sm:$0xff] (!%p1338_p0)  ;;  %v1074_v47 = vmul.f32 (!%p1338_p0), %v1832_v54, %v1832_v54 }
 0x156   : > { %989 = vst [vmem:[%s1738_s6 + $0x20] sm:$0xff] (!%p1338_p0), %v957_v33  ;;  %990 = vst [vmem:[%s1738_s6 + $0x28] sm:$0xff] (!%p1338_p0), %v958_v34  ;;  %v1844_v60 = vld [vmem:[#allocation2 + $0xb0] sm:$0xff] (!%p1338_p0)  ;;  %v1846_v61 = vld [vmem:[#allocation2 + $0xb8] sm:$0xff] (!%p1338_p0) }
 0x157   : > { %v1395_v5 = vpop.f32.mrb[12].mxu0  ;;  %v1411_v6 = vpop.f32.mrb[12].mxu1  ;;  %952 = sbr.rel (%p1338_p0) target bundleno = 414 (0x19e), region = 77  ;;  %991 = vst [vmem:[%s1738_s6 + $0x30] sm:$0xff] (!%p1338_p0), %v1782_v35  ;;  %992 = vst [vmem:[%s1738_s6 + $0x38] sm:$0xff] (!%p1338_p0), %v1784_v36 }
 0x158   : > { %v899_v9 = vadd.f32 %v1395_v5, %v514_v1  ;;  %v915_v10 = vadd.f32 %v1411_v6, %v530_v2  ;;  %v806_v11 = vpop.f32.mrb[13].mxu0  ;;  %v870_v12 = vpop.f32.mrb[13].mxu1  ;;  %1001 = vst [vmem:[%s1738_s6 + $0x80] sm:$0xff] (!%p1338_p0), %v1820_v51  ;;  %1002 = vst [vmem:[%s1738_s6 + $0x88] sm:$0xff] (!%p1338_p0), %v1822_v52  ;;  %v1090_v1 = vadd.f32 (!%p1338_p0), %v1089_v56, %v1059_v49 }
 0x159   : > { %v897_v15 = vadd.f32 %v806_v11, %v512_v3  ;;  %v913_v16 = vadd.f32 %v870_v12, %v528_v4  ;;  %v1396_v17 = vpop.f32.mrb[14].mxu0  ;;  %v1412_v18 = vpop.f32.mrb[14].mxu1  ;;  %v1796_v42 = vld [vmem:[#allocation2 + $0x50] sm:$0xff] (!%p1338_p0)  ;;  %1003 = vst [vmem:[%s1738_s6 + $0x90] sm:$0xff] (!%p1338_p0), %v1830_v53  ;;  %1004 = vst [vmem:[%s1738_s6 + $0x98] sm:$0xff] (!%p1338_p0), %v1832_v54  ;;  %v1021_v2 = vadd.f32 (!%p1338_p0), %v1020_v57, %v958_v34 }
 0x15a   : > { %931 = vst [vmem:[#allocation2 + $0x70] sm:$0xff] %v899_v9  ;;  %947 = vst [vmem:[#allocation2 + $0xf0] sm:$0xff] %v915_v10  ;;  %v900_v19 = vadd.f32 %v1396_v17, %v515_v7  ;;  %v916_v20 = vadd.f32 %v1412_v18, %v531_v8  ;;  %v809_v21 = vpop.f32.mrb[15].mxu0  ;;  %v873_v22 = vpop.f32.mrb[15].mxu1  ;;  %v1786_v37 = vld [vmem:[#allocation2 + $0x40] sm:$0xff] (!%p1338_p0)  ;;  %v1858_v0 = vld [vmem:[#allocation2 + $0xd0] sm:$0xff] (!%p1338_p0)  ;;  %v1061_v3 = vmul.f32 (!%p1338_p0), %v1782_v35, %v1782_v35 }
 0x15b   : > { %929 = vst [vmem:[#allocation2 + $0x60] sm:$0xff] %v897_v15  ;;  %945 = vst [vmem:[#allocation2 + $0xe0] sm:$0xff] %v913_v16  ;;  %v898_v23 = vadd.f32 %v809_v21, %v513_v13  ;;  %v914_v24 = vadd.f32 %v873_v22, %v529_v14  ;;  %v1798_v43 = vld [vmem:[#allocation2 + $0x58] sm:$0xff] (!%p1338_p0)  ;;  %v1854_v62 = vld [vmem:[#allocation2 + $0xc0] sm:$0xff] (!%p1338_p0)  ;;  %v1091_v9 = vadd.f32 (!%p1338_p0), %v1090_v1, %v1060_v58 }
 0x15c   : > { %932 = vst [vmem:[#allocation2 + $0x78] sm:$0xff] %v900_v19  ;;  %948 = vst [vmem:[#allocation2 + $0xf8] sm:$0xff] %v916_v20  ;;  %v1794_v41 = vld [vmem:[#allocation2 + $0x48] sm:$0xff] (!%p1338_p0)  ;;  %v1868_v4 = vld [vmem:[#allocation2 + $0xd8] sm:$0xff] (!%p1338_p0)  ;;  %v1022_v10 = vadd.f32 (!%p1338_p0), %v1021_v2, %v1782_v35  ;;  %v1062_v11 = vmul.f32 (!%p1338_p0), %v1784_v36, %v1784_v36  ;;  %v1063_v14 = vmul.f32 (!%p1338_p0), %v1786_v37, %v1786_v37 }
 0x15d   : > { %930 = vst [vmem:[#allocation2 + $0x68] sm:$0xff] %v898_v23  ;;  %946 = vst [vmem:[#allocation2 + $0xe8] sm:$0xff] %v914_v24  ;;  %v1856_v63 = vld [vmem:[#allocation2 + $0xc8] sm:$0xff] (!%p1338_p0)  ;;  %v1092_v12 = vadd.f32 (!%p1338_p0), %v1091_v9, %v1061_v3  ;;  %v1064_v17 = vmul.f32 (!%p1338_p0), %v1794_v41, %v1794_v41  ;;  %v1065_v20 = vmul.f32 (!%p1338_p0), %v1796_v42, %v1796_v42 }
 0x15e   : > { %993 = vst [vmem:[%s1738_s6 + $0x40] sm:$0xff] %v1786_v37  ;;  %994 = vst [vmem:[%s1738_s6 + $0x48] sm:$0xff] %v1794_v41  ;;  %v1023_v13 = vadd.f32 %v1022_v10, %v1784_v36  ;;  %v1066_v23 = vmul.f32 %v1798_v43, %v1798_v43 }
 0x15f   : > { %995 = vst [vmem:[%s1738_s6 + $0x50] sm:$0xff] %v1796_v42  ;;  %996 = vst [vmem:[%s1738_s6 + $0x58] sm:$0xff] %v1798_v43  ;;  %v1093_v15 = vadd.f32 %v1092_v12, %v1062_v11 }
 0x160   : > { %1005 = vst [vmem:[%s1738_s6 + $0xa0] sm:$0xff] %v1834_v55  ;;  %1006 = vst [vmem:[%s1738_s6 + $0xa8] sm:$0xff] %v1842_v59  ;;  %v1024_v16 = vadd.f32 %v1023_v13, %v1786_v37 }
 0x161   : > { %v1810_v46 = vld [vmem:[#allocation2 + $0x70] sm:$0xff]  ;;  %1007 = vst [vmem:[%s1738_s6 + $0xb0] sm:$0xff] %v1844_v60  ;;  %1008 = vst [vmem:[%s1738_s6 + $0xb8] sm:$0xff] %v1846_v61  ;;  %v1094_v18 = vadd.f32 %v1093_v15, %v1063_v14 }
 0x162   : > { %v1806_v44 = vld [vmem:[#allocation2 + $0x60] sm:$0xff]  ;;  %999 = vst [vmem:[%s1738_s6 + $0x70] sm:$0xff] %v1810_v46  ;;  %1009 = vst [vmem:[%s1738_s6 + $0xc0] sm:$0xff] %v1854_v62  ;;  %v1880_v7 = vld [vmem:[#allocation2 + $0xf0] sm:$0xff]  ;;  %v1025_v19 = vadd.f32 %v1024_v16, %v1794_v41  ;;  %v1069_v32 = vmul.f32 %v1810_v46, %v1810_v46  ;;  %v1072_v41 = vmul.f32 %v1822_v52, %v1822_v52 }
 0x163   : > { %997 = vst [vmem:[%s1738_s6 + $0x60] sm:$0xff] %v1806_v44  ;;  %v1818_v50 = vld [vmem:[#allocation2 + $0x78] sm:$0xff]  ;;  %1010 = vst [vmem:[%s1738_s6 + $0xc8] sm:$0xff] %v1856_v63  ;;  %v1870_v5 = vld [vmem:[#allocation2 + $0xe0] sm:$0xff]  ;;  %v1095_v21 = vadd.f32 %v1094_v18, %v1064_v17  ;;  %v1067_v26 = vmul.f32 %v1806_v44, %v1806_v44 }
 0x164   : > { %v1808_v45 = vld [vmem:[#allocation2 + $0x68] sm:$0xff]  ;;  %1000 = vst [vmem:[%s1738_s6 + $0x78] sm:$0xff] %v1818_v50  ;;  %1011 = vst [vmem:[%s1738_s6 + $0xd0] sm:$0xff] %v1858_v0  ;;  %v1882_v8 = vld [vmem:[#allocation2 + $0xf8] sm:$0xff]  ;;  %v1026_v22 = vadd.f32 %v1025_v19, %v1796_v42  ;;  %v1070_v35 = vmul.f32 %v1818_v50, %v1818_v50 }
 0x165   : > { %998 = vst [vmem:[%s1738_s6 + $0x68] sm:$0xff] %v1808_v45  ;;  %v1872_v6 = vld [vmem:[#allocation2 + $0xe8] sm:$0xff]  ;;  %1012 = vst [vmem:[%s1738_s6 + $0xd8] sm:$0xff] %v1868_v4  ;;  %v1096_v24 = vadd.f32 %v1095_v21, %v1065_v20  ;;  %v1068_v29 = vmul.f32 %v1808_v45, %v1808_v45 }
 0x166   : > { %1013 = vst [vmem:[%s1738_s6 + $0xe0] sm:$0xff] %v1870_v5  ;;  %1014 = vst [vmem:[%s1738_s6 + $0xe8] sm:$0xff] %v1872_v6  ;;  %v1027_v25 = vadd.f32 %v1026_v22, %v1798_v43 }
 0x167   : > { %1015 = vst [vmem:[%s1738_s6 + $0xf0] sm:$0xff] %v1880_v7  ;;  %1016 = vst [vmem:[%s1738_s6 + $0xf8] sm:$0xff] %v1882_v8  ;;  %v1097_v27 = vadd.f32 %v1096_v24, %v1066_v23 }
 0x168   : > { %v1028_v28 = vadd.f32 %v1027_v25, %v1806_v44  ;;  %v1073_v44 = vmul.f32 %v1830_v53, %v1830_v53 }
 0x169   : > { %v1098_v30 = vadd.f32 %v1097_v27, %v1067_v26 }
 0x16a   : > { %v1029_v31 = vadd.f32 %v1028_v28, %v1808_v45 }
 0x16b   : > { %v1099_v33 = vadd.f32 %v1098_v30, %v1068_v29 }
 0x16c   : > { %v1030_v34 = vadd.f32 %v1029_v31, %v1810_v46 }
 0x16d   : > { %v1100_v36 = vadd.f32 %v1099_v33, %v1069_v32 }
 0x16e   : > { %v1031_v37 = vadd.f32 %v1030_v34, %v1818_v50  ;;  %v1075_v50 = vmul.f32 %v1834_v55, %v1834_v55 }
 0x16f   : > { %v1101_v39 = vadd.f32 %v1100_v36, %v1070_v35 }
 0x170   : > { %v1032_v40 = vadd.f32 %v1031_v37, %v1820_v51 }
 0x171   : > { %v1102_v42 = vadd.f32 %v1101_v39, %v1071_v38 }
 0x172   : > { %v1033_v43 = vadd.f32 %v1032_v40, %v1822_v52  ;;  %v1076_v52 = vmul.f32 %v1842_v59, %v1842_v59 }
 0x173   : > { %v1103_v45 = vadd.f32 %v1102_v42, %v1072_v41 }
 0x174   : > { %v1034_v46 = vadd.f32 %v1033_v43, %v1830_v53  ;;  %v1077_v53 = vmul.f32 %v1844_v60, %v1844_v60 }
 0x175   : > { %v1104_v48 = vadd.f32 %v1103_v45, %v1073_v44 }
 0x176   : > { %v1035_v49 = vadd.f32 %v1034_v46, %v1832_v54  ;;  %v1078_v54 = vmul.f32 %v1846_v61, %v1846_v61 }
 0x177   : > { %v1105_v51 = vadd.f32 %v1104_v48, %v1074_v47 }
 0x178   : > { %v1036_v56 = vadd.f32 %v1035_v49, %v1834_v55  ;;  %v1079_v55 = vmul.f32 %v1854_v62, %v1854_v62 }
 0x179   : > { %v1106_v57 = vadd.f32 %v1105_v51, %v1075_v50 }
 0x17a   : > { %v1037_v58 = vadd.f32 %v1036_v56, %v1842_v59  ;;  %v1080_v59 = vmul.f32 %v1856_v63, %v1856_v63 }
 0x17b   : > { %v1107_v1 = vadd.f32 %v1106_v57, %v1076_v52 }
 0x17c   : > { %v1038_v2 = vadd.f32 %v1037_v58, %v1844_v60  ;;  %v1081_v60 = vmul.f32 %v1858_v0, %v1858_v0 }
 0x17d   : > { %v1108_v3 = vadd.f32 %v1107_v1, %v1077_v53 }
 0x17e   : > { %v1039_v9 = vadd.f32 %v1038_v2, %v1846_v61  ;;  %v1082_v61 = vmul.f32 %v1868_v4, %v1868_v4 }
 0x17f   : > { %v1109_v10 = vadd.f32 %v1108_v3, %v1078_v54 }
 0x180   : > { %v1040_v11 = vadd.f32 %v1039_v9, %v1854_v62  ;;  %v1083_v62 = vmul.f32 %v1870_v5, %v1870_v5 }
 0x181   : > { %v1110_v12 = vadd.f32 %v1109_v10, %v1079_v55 }
 0x182   : > { %v1041_v13 = vadd.f32 %v1040_v11, %v1856_v63  ;;  %v1084_v63 = vmul.f32 %v1872_v6, %v1872_v6 }
 0x183   : > { %v1111_v14 = vadd.f32 %v1110_v12, %v1080_v59 }
 0x184   : > { %v1042_v15 = vadd.f32 %v1041_v13, %v1858_v0  ;;  %v1085_v0 = vmul.f32 %v1880_v7, %v1880_v7 }
 0x185   : > { %v1112_v16 = vadd.f32 %v1111_v14, %v1081_v60 }
 0x186   : > { %v1043_v17 = vadd.f32 %v1042_v15, %v1868_v4  ;;  %v1086_v4 = vmul.f32 %v1882_v8, %v1882_v8 }
 0x187   : > { %v1113_v18 = vadd.f32 %v1112_v16, %v1082_v61 }
 0x188   : > { %v1044_v19 = vadd.f32 %v1043_v17, %v1870_v5 }
 0x189   : > { %v1114_v20 = vadd.f32 %v1113_v18, %v1083_v62 }
 0x18a   : > { %v1045_v21 = vadd.f32 %v1044_v19, %v1872_v6 }
 0x18b   : > { %v1115_v22 = vadd.f32 %v1114_v20, %v1084_v63 }
 0x18c   : > { %v1046_v23 = vadd.f32 %v1045_v21, %v1880_v7 }
 0x18d   : > { %v1116_v24 = vadd.f32 %v1115_v22, %v1085_v0 }
 0x18e   : > { %v1047_v5 = vadd.f32 %v1046_v23, %v1882_v8 }
 0x18f   : > { %v1117_v26 = vadd.f32 %v1116_v24, %v1086_v4 }
 0x190   : > { %v1048_v25 = vrot.slane %v1047_v5, 4 }
 0x191   : > { %v1118_v28 = vrot.slane %v1117_v26, 4 }
 0x192   : > { %v1049_v27 = vadd.f32 %v1048_v25, %v1047_v5 }
 0x193   : > { %v1119_v6 = vadd.f32 %v1118_v28, %v1117_v26 }
 0x194   : > { %v1050_v29 = vrot.slane %v1049_v27, 2 }
 0x195   : > { %v1120_v31 = vrot.slane %v1119_v6, 2 }
 0x196   : > { %v1051_v30 = vadd.f32 %v1050_v29, %v1049_v27 }
 0x197   : > { %v1121_v33 = vadd.f32 %v1120_v31, %v1119_v6 }
 0x198   : > { %v1052_v32 = vrot.slane %v1051_v30, 1 }
 0x199   : > { %v1122_v7 = vrot.slane %v1121_v33, 1 }
 0x19a   : > { %v1053_v34 = vadd.f32 %v1052_v32, %v1051_v30 }
 0x19b   : > { %v1123_v35 = vadd.f32 %v1122_v7, %v1121_v33 }
 0x19c   : > { %1054 = vst [vmem:[%s456_s9] sm:$0x1] %v1053_v34 }
 0x19d   : > { %1124 = vst [vmem:[%s462_s12] sm:$0x1] %v1123_v35 }
 0x19e PF: > { %s15_s21 = sadd.s32 1, %s1565_s21   ;;  %s2000_s15 = smov %s1545_s16 }
 0x19f   : > { %p12_p1 = scmp.ge.s32.totalorder %s15_s21, 8   ;;  %s2001_s16 = smov %s1644_s28 }
 0x1a0   : > { %s2002_s17 = smov %s1557_s19  ;;  %s2003_s18 = smov %s1561_s20 }
 0x1a1   : > { %s2004_s19 = smov %s2007_s22  ;;  %s2005_s20 = smov %s2011_s23 }
 0x1a2   :  { %14 = sbr.rel (!%p12_p1) target bundleno = 4 (0x4), region = 139 }

// kernel: double_conv_forward.7
= control target key start
LH: loop header
LB: loop body
LE: loop exit
PB: predicated region body
PF: predicated region fallthrough
CT: control target
= control target key end

     0   :  { %8 = vsyncpa [#allocation3], 0  ;;  %s955_s0 = inlined_call_operand.vmem [shape: f32[512,128], index: 0, kind: input, shape index: {}]   ;;  %s956_s1 = inlined_call_operand.vmem [shape: f32[1,128], index: 1, kind: input, shape index: {}]   ;;  %s957_s2 = inlined_call_operand.vmem [shape: f32[1,128], index: 2, kind: input, shape index: {}]   ;;  %s958_s3 = inlined_call_operand.hbm [shape: f32[512,128], index: 3, kind: output, shape index: {}]  }
   0x1   :  { %10 = vsyncpa [#allocation3 + $0x1], 0  ;;  %s691_s12 = smov 0   ;;  %s693_s13 = smov 0  }
   0x2   :  { %s695_s14 = smov 0   ;;  %s697_s15 = smov 0  }
   0x3   :  { %s699_s16 = smov 0   ;;  %s701_s17 = smov 0  }
   0x4 LB: > { %s513_s18 = sadd.s32 4294967295, %s666_s17   ;;  %s514_s19 = sadd.s32 4294967294, %s666_s17   ;;  %s666_s17 = sphi %s701_s17, %s16_s17   ;;  %s662_s16 = sphi %s699_s16, %s965_s16   ;;  %s658_s15 = sphi %s697_s15, %s964_s15   ;;  %s654_s14 = sphi %s695_s14, %s963_s14   ;;  %s650_s13 = sphi %s693_s13, %s962_s13   ;;  %s646_s12 = sphi %s691_s12, %s961_s12  }
   0x5   : > { %s28_s20 = sadd.s32 1, %s662_s16  ;;  %s117_s21 = sadd.s32 1, %s654_s14 }
   0x6   : > { %p30_p0 = scmp.ge.s32.totalorder %s28_s20, 2  ;;  %p127_p1 = scmp.ne.s32.totalorder %s654_s14, %s650_s13 }
   0x7   : > { %p128_p2 = scmp.eq.s32.totalorder %s513_s18, 1  ;;  %p133_p3 = scmp.ne.s32.totalorder %s650_s13, %s646_s12 }
   0x8   : > { %s967_s20 = smov (%p30_p0, %s28_s20), 0  ;;  %p134_p5 = scmp.eq.s32.totalorder %s514_s19, 1 }
   0x9   : > { %p731_p4 = por %p128_p2, %p127_p1  ;;  %s112_s23 = ssub.s32 %s662_s16, %s967_s20 }
   0xa   : > { %p519_p6 = scmp.ge.s32.totalorder %s666_s17, 1  ;;  %p115_p7 = scmp.eq.s32.totalorder %s112_s23, 0 }
   0xb   : > { %p738_p8 = por %p134_p5, %p133_p3  ;;  %p176_p9 = scmp.lt.s32.totalorder %s666_s17, 3 }
   0xc   : > { %s744_s25 = scalar_select %p115_p7, %s654_s14, %s117_s21  }
   0xd   : > { %p177_p10 = pnand %p519_p6, %p176_p9 }
   0xe   : > { %s521_s26 = sshll.u32 (!%p177_p10), %s658_s15, 5  ;;  %s206_s27 = sand.u32 (!%p177_p10), 1, %s650_s13   ;;  %v751_v0 = vld [vmem:[%s956_s1] ss:$0 sm:$0xff] (!%p177_p10) }
   0xf   : > { %180 = sbr.rel (%p177_p10) target bundleno = 69 (0x45), region = 32  ;;  %p210_p11 = scmp.lt.s32.totalorder (!%p177_p10), %s521_s26, 63  ;;  %v761_v1 = vld [vmem:[%s957_s2] ss:$0 sm:$0xff] (!%p177_p10) }
  0x10   : > { %s768_s9 = sshll.u32 (!%p177_p10), %s206_s27, 8  ;;  %s530_s11 = sshll.u32 (!%p177_p10), %s658_s15, 12 }
  0x11   : > { %s799_s10 = scalar_lea.vmem (!%p177_p10), [#allocation2], %s768_s9  ;;  %s898_s21 = scalar_lea.hbm (!%p177_p10), %s958_s3, %s530_s11 }
  0x12   : > { %s414_s18 = sshll.u32 (!%p177_p10), %s799_s10, 4  ;;  %s909_s23 = scalar_lea.sflag (!%p177_p10), [#allocation3], %s206_s27  ;;  %s900_s18 = int_to_ptr.vmem [resolvable:$true] %s414_s18 }
  0x16   : > { %s969_s26 = smov (!%p210_p11, %s521_s26), 63 }
  0x17   : > { %s522_s28 = sshll.u32 %s969_s26, 3  ;;  %s588_s26 = scalar_lea.vmem %s900_s18, 4096 }
  0x18   : > { %s756_s6 = scalar_lea.vmem %s955_s0, %s522_s28  ;;  %p589_p12 = scmp.ne.s32.totalorder %s900_s18, %s588_s26 }
  0x19   : > { %v225_v2 = vld [vmem:[%s756_s6] sm:$0xff]  ;;  %v226_v3 = vld [vmem:[%s756_s6 + $0x8] sm:$0xff]  ;;  %v227_v4 = vld [vmem:[%s756_s6 + $0x10] sm:$0xff]  ;;  %s668_s28 = smov [#allocation2]  }
  0x1a   : > { %v264_v5 = vmul.f32 %v751_v0, %v225_v2  ;;  %v265_v6 = vmul.f32 %v751_v0, %v226_v3  ;;  %v266_v7 = vmul.f32 %v751_v0, %v227_v4  ;;  %v228_v8 = vld [vmem:[%s756_s6 + $0x18] sm:$0xff]  ;;  %v229_v9 = vld [vmem:[%s756_s6 + $0x20] sm:$0xff]  ;;  %v230_v10 = vld [vmem:[%s756_s6 + $0x28] sm:$0xff]  ;;  %p590_p13 = pnand %p589_p12, %p731_p4  ;;  %s592_s29 = sshll.u32 %s668_s28, 4  ;;  %s593_s29 = int_to_ptr.vmem [resolvable:$false] %s592_s29 }
  0x1b   : > { %v267_v11 = vmul.f32 %v751_v0, %v228_v8  ;;  %v268_v12 = vmul.f32 %v751_v0, %v229_v9  ;;  %v269_v13 = vmul.f32 %v751_v0, %v230_v10  ;;  %v231_v14 = vld [vmem:[%s756_s6 + $0x30] sm:$0xff]  ;;  %v232_v15 = vld [vmem:[%s756_s6 + $0x38] sm:$0xff]  ;;  %v233_v24 = vld [vmem:[%s756_s6 + $0x40] sm:$0xff]  ;;  %s594_s30 = scalar_lea.vmem %s593_s29, 8192  ;;  %p595_p1 = scmp.lt.s32.totalorder %s900_s18, %s593_s29 }
  0x1c   : > { %v303_v16 = vadd.f32 %v761_v1, %v264_v5  ;;  %v304_v17 = vadd.f32 %v761_v1, %v265_v6  ;;  %v305_v18 = vadd.f32 %v761_v1, %v266_v7  ;;  %v270_v19 = vmul.f32 %v751_v0, %v231_v14  ;;  %v234_v25 = vld [vmem:[%s756_s6 + $0x48] sm:$0xff]  ;;  %v235_v26 = vld [vmem:[%s756_s6 + $0x50] sm:$0xff]  ;;  %v236_v31 = vld [vmem:[%s756_s6 + $0x58] sm:$0xff]  ;;  %p591_p0 = pneg %p590_p13  ;;  %p596_p2 = scmp.lt.s32.totalorder %s594_s30, %s588_s26 }
  0x1d   : > { %v306_v20 = vadd.f32 %v761_v1, %v267_v11  ;;  %v307_v21 = vadd.f32 %v761_v1, %v268_v12  ;;  %v308_v22 = vadd.f32 %v761_v1, %v269_v13  ;;  %v271_v23 = vmul.f32 %v751_v0, %v232_v15  ;;  %v237_v32 = vld [vmem:[%s756_s6 + $0x60] sm:$0xff]  ;;  %v238_v33 = vld [vmem:[%s756_s6 + $0x68] sm:$0xff]  ;;  %v239_v38 = vld [vmem:[%s756_s6 + $0x70] sm:$0xff] }
  0x1e   : > { %v335_v27 = vmax.f32 %v303_v16, 0.0  ;;  %v336_v28 = vmax.f32 %v304_v17, 0.0  ;;  %v337_v29 = vmax.f32 %v305_v18, 0.0  ;;  %v309_v30 = vadd.f32 %v761_v1, %v270_v19  ;;  %v240_v43 = vld [vmem:[%s756_s6 + $0x78] sm:$0xff]  ;;  %v241_v56 = vld [vmem:[%s756_s6 + $0x80] sm:$0xff]  ;;  %v242_v57 = vld [vmem:[%s756_s6 + $0x88] sm:$0xff]  ;;  %p597_p3 = por %p596_p2, %p595_p1 }
  0x1f   : > { %v338_v34 = vmax.f32 %v306_v20, 0.0  ;;  %v339_v35 = vmax.f32 %v307_v21, 0.0  ;;  %v340_v36 = vmax.f32 %v308_v22, 0.0  ;;  %v310_v37 = vadd.f32 %v761_v1, %v271_v23  ;;  %v243_v58 = vld [vmem:[%s756_s6 + $0x90] sm:$0xff]  ;;  %v244_v63 = vld [vmem:[%s756_s6 + $0x98] sm:$0xff]  ;;  %v245_v2 = vld [vmem:[%s756_s6 + $0xa0] sm:$0xff] }
  0x20   : > { %367 = vst [vmem:[%s799_s10] sm:$0xff] %v335_v27  ;;  %368 = vst [vmem:[%s799_s10 + $0x8] sm:$0xff] %v336_v28  ;;  %v341_v39 = vmax.f32 %v309_v30, 0.0  ;;  %v272_v40 = vmul.f32 %v751_v0, %v233_v24  ;;  %v273_v41 = vmul.f32 %v751_v0, %v234_v25  ;;  %v274_v42 = vmul.f32 %v751_v0, %v235_v26  ;;  %v246_v3 = vld [vmem:[%s756_s6 + $0xa8] sm:$0xff]  ;;  %v247_v8 = vld [vmem:[%s756_s6 + $0xb0] sm:$0xff]  ;;  %p598_p5 = pnand %p597_p3, %p591_p0 }
  0x21   : > { %369 = vst [vmem:[%s799_s10 + $0x10] sm:$0xff] %v337_v29  ;;  %370 = vst [vmem:[%s799_s10 + $0x18] sm:$0xff] %v338_v34  ;;  %v342_v44 = vmax.f32 %v310_v37, 0.0  ;;  %v275_v45 = vmul.f32 %v751_v0, %v236_v31  ;;  %v276_v46 = vmul.f32 %v751_v0, %v237_v32  ;;  %v277_v47 = vmul.f32 %v751_v0, %v238_v33  ;;  %v248_v13 = vld [vmem:[%s756_s6 + $0xb8] sm:$0xff]  ;;  %v249_v26 = vld [vmem:[%s756_s6 + $0xc0] sm:$0xff] }
  0x22   : > { %371 = vst [vmem:[%s799_s10 + $0x20] sm:$0xff] %v339_v35  ;;  %372 = vst [vmem:[%s799_s10 + $0x28] sm:$0xff] %v340_v36  ;;  %v311_v48 = vadd.f32 %v761_v1, %v272_v40  ;;  %v312_v49 = vadd.f32 %v761_v1, %v273_v41  ;;  %v313_v50 = vadd.f32 %v761_v1, %v274_v42  ;;  %v250_v27 = vld [vmem:[%s756_s6 + $0xc8] sm:$0xff]  ;;  %v251_v28 = vld [vmem:[%s756_s6 + $0xd0] sm:$0xff] }
  0x23   : > { %373 = vst [vmem:[%s799_s10 + $0x30] sm:$0xff] %v341_v39  ;;  %v278_v51 = vmul.f32 %v751_v0, %v239_v38  ;;  %374 = vst [vmem:[%s799_s10 + $0x38] sm:$0xff] %v342_v44  ;;  %v314_v52 = vadd.f32 %v761_v1, %v275_v45  ;;  %v315_v53 = vadd.f32 %v761_v1, %v276_v46  ;;  %v252_v33 = vld [vmem:[%s756_s6 + $0xd8] sm:$0xff]  ;;  %v253_v34 = vld [vmem:[%s756_s6 + $0xe0] sm:$0xff] }
  0x24   : > { %v316_v54 = vadd.f32 %v761_v1, %v277_v47  ;;  %v279_v55 = vmul.f32 %v751_v0, %v240_v43  ;;  %v343_v59 = vmax.f32 %v311_v48, 0.0  ;;  %v344_v60 = vmax.f32 %v312_v49, 0.0  ;;  %v254_v35 = vld [vmem:[%s756_s6 + $0xe8] sm:$0xff]  ;;  %v255_v40 = vld [vmem:[%s756_s6 + $0xf0] sm:$0xff]  ;;  %v256_v45 = vld [vmem:[%s756_s6 + $0xf8] sm:$0xff] }
  0x25   : > { %v345_v61 = vmax.f32 %v313_v50, 0.0  ;;  %v317_v62 = vadd.f32 %v761_v1, %v278_v51  ;;  %v346_v4 = vmax.f32 %v314_v52, 0.0  ;;  %v347_v5 = vmax.f32 %v315_v53, 0.0 }
  0x26   : > { %v348_v6 = vmax.f32 %v316_v54, 0.0  ;;  %v318_v7 = vadd.f32 %v761_v1, %v279_v55  ;;  %375 = vst [vmem:[%s799_s10 + $0x40] sm:$0xff] %v343_v59  ;;  %376 = vst [vmem:[%s799_s10 + $0x48] sm:$0xff] %v344_v60  ;;  %v280_v10 = vmul.f32 %v751_v0, %v241_v56  ;;  %v281_v11 = vmul.f32 %v751_v0, %v242_v57 }
  0x27   : > { %377 = vst [vmem:[%s799_s10 + $0x50] sm:$0xff] %v345_v61  ;;  %v349_v9 = vmax.f32 %v317_v62, 0.0  ;;  %v282_v12 = vmul.f32 %v751_v0, %v243_v58  ;;  %378 = vst [vmem:[%s799_s10 + $0x58] sm:$0xff] %v346_v4  ;;  %v283_v15 = vmul.f32 %v751_v0, %v244_v63  ;;  %v284_v16 = vmul.f32 %v751_v0, %v245_v2 }
  0x28   : > { %379 = vst [vmem:[%s799_s10 + $0x60] sm:$0xff] %v347_v5  ;;  %380 = vst [vmem:[%s799_s10 + $0x68] sm:$0xff] %v348_v6  ;;  %v350_v14 = vmax.f32 %v318_v7, 0.0  ;;  %v285_v17 = vmul.f32 %v751_v0, %v246_v3  ;;  %v319_v18 = vadd.f32 %v761_v1, %v280_v10  ;;  %v320_v19 = vadd.f32 %v761_v1, %v281_v11 }
  0x29   : > { %381 = vst [vmem:[%s799_s10 + $0x70] sm:$0xff] %v349_v9  ;;  %v321_v20 = vadd.f32 %v761_v1, %v282_v12  ;;  %v286_v21 = vmul.f32 %v751_v0, %v247_v8  ;;  %v322_v22 = vadd.f32 %v761_v1, %v283_v15  ;;  %v323_v23 = vadd.f32 %v761_v1, %v284_v16 }
  0x2a   : > { %382 = vst [vmem:[%s799_s10 + $0x78] sm:$0xff] %v350_v14  ;;  %v324_v24 = vadd.f32 %v761_v1, %v285_v17  ;;  %v287_v25 = vmul.f32 %v751_v0, %v248_v13  ;;  %v351_v29 = vmax.f32 %v319_v18, 0.0  ;;  %v352_v30 = vmax.f32 %v320_v19, 0.0 }
  0x2b   : > { %v353_v31 = vmax.f32 %v321_v20, 0.0  ;;  %v325_v32 = vadd.f32 %v761_v1, %v286_v21  ;;  %v354_v36 = vmax.f32 %v322_v22, 0.0  ;;  %v355_v37 = vmax.f32 %v323_v23, 0.0 }
  0x2c   : > { %v356_v38 = vmax.f32 %v324_v24, 0.0  ;;  %v326_v39 = vadd.f32 %v761_v1, %v287_v25  ;;  %383 = vst [vmem:[%s799_s10 + $0x80] sm:$0xff] %v351_v29  ;;  %384 = vst [vmem:[%s799_s10 + $0x88] sm:$0xff] %v352_v30  ;;  %v288_v42 = vmul.f32 %v751_v0, %v249_v26  ;;  %v289_v43 = vmul.f32 %v751_v0, %v250_v27 }
  0x2d   : > { %385 = vst [vmem:[%s799_s10 + $0x90] sm:$0xff] %v353_v31  ;;  %v357_v41 = vmax.f32 %v325_v32, 0.0  ;;  %v290_v44 = vmul.f32 %v751_v0, %v251_v28  ;;  %386 = vst [vmem:[%s799_s10 + $0x98] sm:$0xff] %v354_v36  ;;  %v291_v47 = vmul.f32 %v751_v0, %v252_v33  ;;  %v292_v48 = vmul.f32 %v751_v0, %v253_v34 }
  0x2e   : > { %387 = vst [vmem:[%s799_s10 + $0xa0] sm:$0xff] %v355_v37  ;;  %388 = vst [vmem:[%s799_s10 + $0xa8] sm:$0xff] %v356_v38  ;;  %v358_v46 = vmax.f32 %v326_v39, 0.0  ;;  %v293_v49 = vmul.f32 %v751_v0, %v254_v35  ;;  %v327_v50 = vadd.f32 %v761_v1, %v288_v42  ;;  %v328_v51 = vadd.f32 %v761_v1, %v289_v43 }
  0x2f   : > { %389 = vst [vmem:[%s799_s10 + $0xb0] sm:$0xff] %v357_v41  ;;  %v329_v52 = vadd.f32 %v761_v1, %v290_v44  ;;  %v294_v53 = vmul.f32 %v751_v0, %v255_v40  ;;  %v330_v54 = vadd.f32 %v761_v1, %v291_v47  ;;  %v331_v55 = vadd.f32 %v761_v1, %v292_v48 }
  0x30   : > { %390 = vst [vmem:[%s799_s10 + $0xb8] sm:$0xff] %v358_v46  ;;  %v332_v56 = vadd.f32 %v761_v1, %v293_v49  ;;  %v295_v57 = vmul.f32 %v751_v0, %v256_v45  ;;  %v359_v58 = vmax.f32 %v327_v50, 0.0  ;;  %v360_v59 = vmax.f32 %v328_v51, 0.0 }
  0x31   : > { %v361_v60 = vmax.f32 %v329_v52, 0.0  ;;  %v333_v61 = vadd.f32 %v761_v1, %v294_v53  ;;  %v362_v62 = vmax.f32 %v330_v54, 0.0  ;;  %v363_v63 = vmax.f32 %v331_v55, 0.0 }
  0x32   : > { %v364_v2 = vmax.f32 %v332_v56, 0.0  ;;  %v334_v3 = vadd.f32 %v761_v1, %v295_v57  ;;  %391 = vst [vmem:[%s799_s10 + $0xc0] sm:$0xff] %v359_v58  ;;  %392 = vst [vmem:[%s799_s10 + $0xc8] sm:$0xff] %v360_v59 }
  0x33   : > { %393 = vst [vmem:[%s799_s10 + $0xd0] sm:$0xff] %v361_v60  ;;  %v365_v0 = vmax.f32 %v333_v61, 0.0  ;;  %394 = vst [vmem:[%s799_s10 + $0xd8] sm:$0xff] %v362_v62 }
  0x34   : > { %395 = vst [vmem:[%s799_s10 + $0xe0] sm:$0xff] %v363_v63  ;;  %396 = vst [vmem:[%s799_s10 + $0xe8] sm:$0xff] %v364_v2  ;;  %v366_v4 = vmax.f32 %v334_v3, 0.0 }
  0x35   : > { %397 = vst [vmem:[%s799_s10 + $0xf0] sm:$0xff] %v365_v0 }
  0x36   : > { %398 = vst [vmem:[%s799_s10 + $0xf8] sm:$0xff] %v366_v4 }
  0x37   : > { %601 = shalt.err (!%p598_p5)
}
  0x38   : > { %s602_s27 = scalar_lea.hbm %s898_s21, 4096  ;;  %s606_s6 = scalar_lea.hbm %s958_s3, 8192 }
  0x39   : > { %p603_p6 = scmp.ne.s32.totalorder %s898_s21, %s602_s27  ;;  %p607_p10 = scmp.lt.u32.totalorder %s898_s21, %s958_s3 }
  0x3a   : > { %p608_p11 = scmp.lt.u32.totalorder %s606_s6, %s602_s27  ;;  %p610_p13 = scmp.lt.u32.totalorder %s602_s27, %s898_s21 }
  0x3b   : > { %p604_p7 = pnand %p603_p6, %p731_p4 }
  0x3c   : > { %p609_p12 = por %p608_p11, %p607_p10 }
  0x3d   : > { %p605_p9 = pneg %p604_p7 }
  0x3e   : > { %p611_p0 = por %p610_p13, %p609_p12 }
  0x40   : > { %p612_p1 = pnand %p611_p0, %p605_p9 }
  0x42   : > { %615 = shalt.err (!%p612_p1)
}
  0x43   : > { %s669_s9 = smov 128   ;;  %s670_s10 = smov 8  }
  0x44   : > { %531 = dma.vmem_to_hbm [thread:$0]  (%p731_p4), %s900_s18, 4096, %s898_s21, %s909_s23, %s669_s9, %s669_s9, %s670_s10  }
  0x45 PF: > { %p537_p2 = scmp.ge.s32.totalorder %s666_s17, 2  ;;  %s429_s11 = sand.u32 1, %s646_s12  }
  0x46   : > { %s430_s15 = scalar_lea.sflag [#allocation3], %s429_s11 }
  0x47   : > { %p534_p3 = pnand %p537_p2, %p738_p8 }
  0x49   : > { %641 = dma.done.wait (!%p534_p3), %s430_s15, 4096  }
  0x4a   : > { %643 = vsyncadd (!%p534_p3), %s430_s15, 4294963200  ;;  %s16_s17 = sadd.s32 1, %s666_s17   ;;  %s961_s12 = smov %s650_s13 }
  0x4b   : > { %p13_p5 = scmp.ge.s32.totalorder %s16_s17, 4   ;;  %s962_s13 = smov %s654_s14 }
  0x4c   : > { %s963_s14 = smov %s744_s25  ;;  %s964_s15 = smov %s662_s16 }
  0x4d   : > { %s965_s16 = smov %s967_s20  ;;  %15 = sbr.rel (!%p13_p5) target bundleno = 4 (0x4), region = 73 }
  0x54   :  { %435 = vsyncpa [#allocation3], 1 }
  0x55   :  { %437 = vsyncpa [#allocation3 + $0x1], 1 }

</bundles_post_ra>
